<compile_context>
chip_gen: v6e
topology: v6e:2x2x1
jax: 0.10.0
libtpu: 0.0.40
codegen_flags: <defaults>
</compile_context>

<pallas_src>
import math

import numpy as np
import jax
import jax.numpy as jnp
from jax.experimental import pallas as pl
from jax.experimental.pallas import tpu as pltpu


def _layernorm(v, w, b, eps):
    mu = jnp.mean(v, axis=-1, keepdims=True)
    c = v - mu
    var = jnp.mean(c * c, axis=-1, keepdims=True)
    return c * jax.lax.rsqrt(var + eps) * w + b


def make_transformer_block_kernel(n_heads, head_dim, hidden, norm_eps,
                                  qk_norm_eps, q_tile, compute_dtype,
                                  approx_recip):
    half = head_dim // 2
    scale = 1.0 / math.sqrt(head_dim)
    cd = compute_dtype

    def kernel(x_ref, mod_ref, sin_ref, cos_ref,
               anw_ref, anb_ref, qnw_ref, qnb_ref, knw_ref, knb_ref,
               fnw_ref, fnb_ref,
               wq_ref, wk_ref, wv_ref, wo_ref, w13_ref, w2_ref,
               o_ref,
               qrot_ref, krot_ref, v_ref, attn_ref):
        x = x_ref[0].astype(jnp.float32)               # (S, D)
        S = x.shape[0]

        mod = mod_ref[0].astype(jnp.float32)           # (6, D)
        shift_msa, scale_msa, gate_msa = mod[0:1], mod[1:2], mod[2:3]
        shift_mlp, scale_mlp, gate_mlp = mod[3:4], mod[4:5], mod[5:6]

        # ---- attention branch: LN + modulate + QKV (bf16 MXU, f32 accum) ----
        h = _layernorm(x, anw_ref[...], anb_ref[...], norm_eps)
        h = (h * (1.0 + scale_msa) + shift_msa).astype(cd)

        q = jnp.dot(h, wq_ref[...], preferred_element_type=jnp.float32)
        k = jnp.dot(h, wk_ref[...], preferred_element_type=jnp.float32)
        v = jnp.dot(h, wv_ref[...], preferred_element_type=jnp.float32)
        q = _layernorm(q, qnw_ref[...], qnb_ref[...], qk_norm_eps)
        k = _layernorm(k, knw_ref[...], knb_ref[...], qk_norm_eps)
        v_ref[...] = v.astype(cd)

        sin = sin_ref[...]                             # (S, half)
        cos = cos_ref[...]

        # rotate-half RoPE per head, written to contiguous scratch (masked
        # lane-offset stores, no cross-lane concat); 1/sqrt(hd) folded into q.
        for hh in range(n_heads):
            lo = hh * head_dim
            a = slice(lo, lo + half)
            b = slice(lo + half, lo + head_dim)
            q1, q2 = q[:, a], q[:, b]
            k1, k2 = k[:, a], k[:, b]
            qrot_ref[:, a] = ((q1 * cos - q2 * sin) * scale).astype(cd)
            qrot_ref[:, b] = ((q2 * cos + q1 * sin) * scale).astype(cd)
            krot_ref[:, a] = (k1 * cos - k2 * sin).astype(cd)
            krot_ref[:, b] = (k2 * cos + k1 * sin).astype(cd)

        dn = (((1,), (1,)), ((), ()))                  # q @ k^T (contract lanes)

        def q_tile_body(qi, carry):
            r0 = pl.multiple_of(qi * q_tile, q_tile)
            for hh in range(n_heads):
                sl = slice(hh * head_dim, (hh + 1) * head_dim)
                qh = qrot_ref[pl.ds(r0, q_tile), sl]   # (TQ, hd)  compute dtype
                kh = krot_ref[:, sl]                   # (S, hd)
                s = jax.lax.dot_general(qh, kh, dn,
                                        preferred_element_type=jnp.float32)
                s = s - jnp.max(s, axis=-1, keepdims=True)
                p = jnp.exp(s)
                l = jnp.sum(p, axis=-1, keepdims=True)
                if approx_recip:
                    inv = pl.reciprocal(l, approx=True)
                else:
                    inv = 1.0 / l
                p = (p * inv).astype(cd)
                oh = jnp.dot(p, v_ref[:, sl],
                             preferred_element_type=jnp.float32)   # (TQ, hd)
                attn_ref[pl.ds(r0, q_tile), sl] = oh.astype(cd)
            return carry

        jax.lax.fori_loop(0, S // q_tile, q_tile_body, 0)

        # single K=D output projection over all heads at once
        attn_out = jnp.dot(attn_ref[...], wo_ref[...],
                           preferred_element_type=jnp.float32)      # (S, D) f32
        x1 = x + gate_msa * attn_out

        # ---- feed-forward branch (SwiGLU), fused [w1|w3] matmul ----
        h2 = _layernorm(x1, fnw_ref[...], fnb_ref[...], norm_eps)
        h2 = (h2 * (1.0 + scale_mlp) + shift_mlp).astype(cd)
        g13 = jnp.dot(h2, w13_ref[...], preferred_element_type=jnp.float32)
        g1 = g13[:, :hidden]
        g3 = g13[:, hidden:]
        ff = ((g1 * jax.nn.sigmoid(g1)) * g3).astype(cd)
        ff = jnp.dot(ff, w2_ref[...], preferred_element_type=jnp.float32)

        o_ref[0] = (x1 + gate_mlp * ff).astype(o_ref.dtype)

    return kernel


def transformer_block(x, adaln_input, sin, cos, params, *, n_heads,
                      norm_eps=1e-5, qk_norm_eps=1e-5,
                      compute_dtype=jnp.bfloat16, q_tile=256):
    """x: (B, S, D); adaln_input: (B, C); sin/cos: (S, head_dim//2)."""
    B, S, D = x.shape
    head_dim = D // n_heads
    hidden = params["w1"].shape[1]
    cd = np.dtype(compute_dtype)
    approx_recip = cd != np.dtype(jnp.float32)

    # adaLN modulation stays in XLA: the (cond, 6*dim) w_ada is the single
    # biggest VMEM consumer for an M=1 matmul, so it never enters the kernel.
    mod = (jnp.dot(jax.nn.silu(adaln_input.astype(jnp.float32)),
                   params["w_ada"].astype(jnp.float32),
                   precision=jax.lax.Precision.HIGHEST)
           + params["b_ada"].astype(jnp.float32))
    mod = mod.reshape(B, 6, D)

    # gate/up projections fused into one weight (single MXU pass over LHS).
    w13 = jnp.concatenate([params["w1"], params["w3"]], axis=1).astype(cd)

    def row(v):  # 1-D param -> (1, n) for lane-axis broadcast inside the kernel
        return v.reshape(1, -1).astype(jnp.float32)

    tq = q_tile if (S % q_tile == 0 and S > q_tile) else S

    inputs = [
        x, mod,
        sin.astype(jnp.float32), cos.astype(jnp.float32),
        row(params["attn_norm_w"]), row(params["attn_norm_b"]),
        row(params["q_norm_w"]), row(params["q_norm_b"]),
        row(params["k_norm_w"]), row(params["k_norm_b"]),
        row(params["ffn_norm_w"]), row(params["ffn_norm_b"]),
        params["wq"].astype(cd), params["wk"].astype(cd),
        params["wv"].astype(cd), params["wo"].astype(cd),
        w13, params["w2"].astype(cd),
    ]

    def resident(arr):  # whole array stays VMEM-resident across the batch grid
        nd = arr.ndim
        return pl.BlockSpec(arr.shape, lambda b, _nd=nd: (0,) * _nd)

    in_specs = [
        pl.BlockSpec((1, S, D), lambda b: (b, 0, 0)),   # x: pipelined per batch
        pl.BlockSpec((1, 6, D), lambda b: (b, 0, 0)),   # modulation rows
    ] + [resident(a) for a in inputs[2:]]

    kernel = make_transformer_block_kernel(
        n_heads, head_dim, hidden, norm_eps, qk_norm_eps, tq, cd, approx_recip)

    return pl.pallas_call(
        kernel,
        out_shape=jax.ShapeDtypeStruct((B, S, D), x.dtype),
        grid=(B,),
        in_specs=in_specs,
        out_specs=pl.BlockSpec((1, S, D), lambda b: (b, 0, 0)),
        scratch_shapes=[
            pltpu.VMEM((S, D), cd),   # rotated Q (scale folded in)
            pltpu.VMEM((S, D), cd),   # rotated K
            pltpu.VMEM((S, D), cd),   # V
            pltpu.VMEM((S, D), cd),   # per-head outputs before Wo
        ],
        compiler_params=pltpu.CompilerParams(
            dimension_semantics=("parallel",),          # 2-TC sharding on v7x
            vmem_limit_bytes=64 * 1024 * 1024),
    )(*inputs)


def precompute_sin_cos(dim, seq_len, theta=10000.0):
    inv_freq = 1.0 / theta ** (jnp.arange(0, dim, 2, dtype=jnp.float32) / dim)
    positions = jnp.arange(seq_len, dtype=jnp.float32)
    sinusoid = jnp.einsum("i,j->ij", positions, inv_freq)
    return jnp.sin(sinusoid), jnp.cos(sinusoid)


def init_params(key, dim, n_heads, multiple_of, ffn_dim_multiplier=None):
    del n_heads  # head split is implicit in the (dim, dim) projections
    cond_dim = min(dim, 1024)
    hidden = int(2 * (4 * dim) / 3)
    if ffn_dim_multiplier:
        hidden = int(ffn_dim_multiplier * hidden)
    hidden = multiple_of * ((hidden + multiple_of - 1) // multiple_of)

    ks = jax.random.split(key, 17)
    nrm = lambda k, shape, s: s * jax.random.normal(k, shape, jnp.float32)
    return {
        "wq": nrm(ks[0], (dim, dim), 0.1),
        "wk": nrm(ks[1], (dim, dim), 0.1),
        "wv": nrm(ks[2], (dim, dim), 0.1),
        "wo": nrm(ks[3], (dim, dim), 0.1),
        "q_norm_w": 1.0 + nrm(ks[4], (dim,), 0.1),
        "q_norm_b": nrm(ks[5], (dim,), 0.1),
        "k_norm_w": 1.0 + nrm(ks[6], (dim,), 0.1),
        "k_norm_b": nrm(ks[7], (dim,), 0.1),
        "attn_norm_w": 1.0 + nrm(ks[8], (dim,), 0.1),
        "attn_norm_b": nrm(ks[9], (dim,), 0.1),
        "ffn_norm_w": 1.0 + nrm(ks[10], (dim,), 0.1),
        "ffn_norm_b": nrm(ks[11], (dim,), 0.1),
        "w1": nrm(ks[12], (dim, hidden), 0.1),
        "w3": nrm(ks[13], (dim, hidden), 0.1),
        "w2": nrm(ks[14], (hidden, dim), 0.1),
        "w_ada": nrm(ks[15], (cond_dim, 6 * dim), 0.1),
        "b_ada": nrm(ks[16], (6 * dim,), 0.1),
    }


def reference_jax(x, adaln, sin, cos, params, *, n_heads, norm_eps=1e-5,
                  qk_norm_eps=1e-5):
    P = jax.lax.Precision.HIGHEST
    B, S, D = x.shape
    hd = D // n_heads

    def ln(v, w, b, eps):
        mu = jnp.mean(v, axis=-1, keepdims=True)
        var = jnp.mean((v - mu) ** 2, axis=-1, keepdims=True)
        return (v - mu) / jnp.sqrt(var + eps) * w + b

    mod = jnp.dot(jax.nn.silu(adaln), params["w_ada"],
                  precision=P) + params["b_ada"]
    (shift_msa, scale_msa, gate_msa,
     shift_mlp, scale_mlp, gate_mlp) = jnp.split(mod, 6, axis=1)

    h = ln(x, params["attn_norm_w"], params["attn_norm_b"], norm_eps)
    h = h * (1.0 + scale_msa[:, None, :]) + shift_msa[:, None, :]

    q = jnp.einsum("bsd,de->bse", h, params["wq"], precision=P)
    k = jnp.einsum("bsd,de->bse", h, params["wk"], precision=P)
    v = jnp.einsum("bsd,de->bse", h, params["wv"], precision=P)
    q = ln(q, params["q_norm_w"], params["q_norm_b"], qk_norm_eps)
    k = ln(k, params["k_norm_w"], params["k_norm_b"], qk_norm_eps)

    q = q.reshape(B, S, n_heads, hd)
    k = k.reshape(B, S, n_heads, hd)
    v = v.reshape(B, S, n_heads, hd)

    sin_f = jnp.concatenate([sin, sin], axis=-1)[None, :, None, :]
    cos_f = jnp.concatenate([cos, cos], axis=-1)[None, :, None, :]

    def rot_half(t):
        t1, t2 = jnp.split(t, 2, axis=-1)
        return jnp.concatenate([-t2, t1], axis=-1)

    q = q * cos_f + rot_half(q) * sin_f
    k = k * cos_f + rot_half(k) * sin_f

    att = jnp.einsum("bqhd,bkhd->bhqk", q, k, precision=P) / math.sqrt(hd)
    att = jax.nn.softmax(att, axis=-1)
    out = jnp.einsum("bhqk,bkhd->bqhd", att, v, precision=P).reshape(B, S, D)
    attn_out = jnp.einsum("bsd,de->bse", out, params["wo"], precision=P)
    x1 = x + gate_msa[:, None, :] * attn_out

    h2 = ln(x1, params["ffn_norm_w"], params["ffn_norm_b"], norm_eps)
    h2 = h2 * (1.0 + scale_mlp[:, None, :]) + shift_mlp[:, None, :]
    g1 = jnp.einsum("bsd,df->bsf", h2, params["w1"], precision=P)
    g3 = jnp.einsum("bsd,df->bsf", h2, params["w3"], precision=P)
    ff = jnp.einsum("bsf,fd->bsd", jax.nn.silu(g1) * g3, params["w2"],
                    precision=P)
    return x1 + gate_mlp[:, None, :] * ff


if __name__ == "__main__":
    batch, seq, dim, n_heads = 2, 8, 32, 4
    multiple_of = 32
    norm_eps = 1e-5
    head_dim = dim // n_heads

    key = jax.random.PRNGKey(0)
    kp, kx, ka = jax.random.split(key, 3)
    params = init_params(kp, dim, n_heads, multiple_of)
    x = jax.random.normal(kx, (batch, seq, dim), jnp.float32)
    adaln = jax.random.normal(ka, (batch, min(dim, 1024)), jnp.float32)
    sin, cos = precompute_sin_cos(head_dim, seq)

    ref = reference_jax(x, adaln, sin, cos, params, n_heads=n_heads,
                        norm_eps=norm_eps)

    # 1) f32 compute path: tight structural-correctness check.
    out_f32 = transformer_block(x, adaln, sin, cos, params, n_heads=n_heads,
                                norm_eps=norm_eps, compute_dtype=jnp.float32)
    out_f32 = jax.block_until_ready(out_f32)
    assert out_f32.shape == (batch, seq, dim)
    err32 = float(jnp.max(jnp.abs(out_f32 - ref)))
    assert jnp.allclose(out_f32, ref, atol=2e-3, rtol=2e-3), (
        f"f32 mismatch vs reference, max abs err {err32}")

    # 2) bf16 matmul path (production configuration): loose check — the gap vs
    #    the f32 reference is bf16 operand quantization, not kernel structure.
    out_bf16 = transformer_block(x, adaln, sin, cos, params, n_heads=n_heads,
                                 norm_eps=norm_eps, compute_dtype=jnp.bfloat16)
    out_bf16 = jax.block_until_ready(out_bf16)
    err16 = float(jnp.max(jnp.abs(out_bf16 - ref)))
    assert err16 < 1.5e-1, f"bf16 mismatch vs reference, max abs err {err16}"

    print("KERNEL_OK")
</pallas_src>

<mosaic_0001>
module attributes {stable_mosaic.version = 11 : i64} {
  func.func @kernel(%arg0: i32, %arg1: memref<1x8x32xf32, #tpu.memory_space<vmem>>, %arg2: memref<1x6x32xf32, #tpu.memory_space<vmem>>, %arg3: memref<8x4xf32, #tpu.memory_space<vmem>>, %arg4: memref<8x4xf32, #tpu.memory_space<vmem>>, %arg5: memref<1x32xf32, #tpu.memory_space<vmem>>, %arg6: memref<1x32xf32, #tpu.memory_space<vmem>>, %arg7: memref<1x32xf32, #tpu.memory_space<vmem>>, %arg8: memref<1x32xf32, #tpu.memory_space<vmem>>, %arg9: memref<1x32xf32, #tpu.memory_space<vmem>>, %arg10: memref<1x32xf32, #tpu.memory_space<vmem>>, %arg11: memref<1x32xf32, #tpu.memory_space<vmem>>, %arg12: memref<1x32xf32, #tpu.memory_space<vmem>>, %arg13: memref<32x32xf32, #tpu.memory_space<vmem>>, %arg14: memref<32x32xf32, #tpu.memory_space<vmem>>, %arg15: memref<32x32xf32, #tpu.memory_space<vmem>>, %arg16: memref<32x32xf32, #tpu.memory_space<vmem>>, %arg17: memref<32x192xf32, #tpu.memory_space<vmem>>, %arg18: memref<96x32xf32, #tpu.memory_space<vmem>>, %arg19: memref<1x8x32xf32, #tpu.memory_space<vmem>>, %arg20: memref<8x32xf32, #tpu.memory_space<vmem>>, %arg21: memref<8x32xf32, #tpu.memory_space<vmem>>, %arg22: memref<8x32xf32, #tpu.memory_space<vmem>>, %arg23: memref<8x32xf32, #tpu.memory_space<vmem>>) attributes {dimension_semantics = [#tpu.dimension_semantics<parallel>], iteration_bounds = array<i64: 2>, scalar_prefetch = 0 : i64, scratch_operands = 4 : i64, tpu.core_type = #tpu.core_type<tc>, window_params = [{transform_indices = @transform_0, window_bounds = array<i64: 1, 8, 32>}, {transform_indices = @transform_1, window_bounds = array<i64: 1, 6, 32>}, {pipeline_mode = #tpu.pipeline_mode<synchronous>, transform_indices = @transform_2, window_bounds = array<i64: 8, 4>}, {pipeline_mode = #tpu.pipeline_mode<synchronous>, transform_indices = @transform_3, window_bounds = array<i64: 8, 4>}, {pipeline_mode = #tpu.pipeline_mode<synchronous>, transform_indices = @transform_4, window_bounds = array<i64: 1, 32>}, {pipeline_mode = #tpu.pipeline_mode<synchronous>, transform_indices = @transform_5, window_bounds = array<i64: 1, 32>}, {pipeline_mode = #tpu.pipeline_mode<synchronous>, transform_indices = @transform_6, window_bounds = array<i64: 1, 32>}, {pipeline_mode = #tpu.pipeline_mode<synchronous>, transform_indices = @transform_7, window_bounds = array<i64: 1, 32>}, {pipeline_mode = #tpu.pipeline_mode<synchronous>, transform_indices = @transform_8, window_bounds = array<i64: 1, 32>}, {pipeline_mode = #tpu.pipeline_mode<synchronous>, transform_indices = @transform_9, window_bounds = array<i64: 1, 32>}, {pipeline_mode = #tpu.pipeline_mode<synchronous>, transform_indices = @transform_10, window_bounds = array<i64: 1, 32>}, {pipeline_mode = #tpu.pipeline_mode<synchronous>, transform_indices = @transform_11, window_bounds = array<i64: 1, 32>}, {pipeline_mode = #tpu.pipeline_mode<synchronous>, transform_indices = @transform_12, window_bounds = array<i64: 32, 32>}, {pipeline_mode = #tpu.pipeline_mode<synchronous>, transform_indices = @transform_13, window_bounds = array<i64: 32, 32>}, {pipeline_mode = #tpu.pipeline_mode<synchronous>, transform_indices = @transform_14, window_bounds = array<i64: 32, 32>}, {pipeline_mode = #tpu.pipeline_mode<synchronous>, transform_indices = @transform_15, window_bounds = array<i64: 32, 32>}, {pipeline_mode = #tpu.pipeline_mode<synchronous>, transform_indices = @transform_16, window_bounds = array<i64: 32, 192>}, {pipeline_mode = #tpu.pipeline_mode<synchronous>, transform_indices = @transform_17, window_bounds = array<i64: 96, 32>}, {transform_indices = @transform_18, window_bounds = array<i64: 1, 8, 32>}]} {
    %c0 = arith.constant 0 : index
    %c0_0 = arith.constant 0 : index
    %c0_1 = arith.constant 0 : index
    %0 = vector.load %arg1[%c0, %c0_0, %c0_1] : memref<1x8x32xf32, #tpu.memory_space<vmem>>, vector<1x8x32xf32>
    %1 = vector.shape_cast %0 : vector<1x8x32xf32> to vector<8x32xf32>
    %c0_2 = arith.constant 0 : index
    %c0_3 = arith.constant 0 : index
    %c0_4 = arith.constant 0 : index
    %2 = vector.load %arg2[%c0_2, %c0_3, %c0_4] : memref<1x6x32xf32, #tpu.memory_space<vmem>>, vector<1x6x32xf32>
    %3 = vector.shape_cast %2 : vector<1x6x32xf32> to vector<6x32xf32>
    %4 = vector.extract_strided_slice %3 {offsets = [0, 0], sizes = [1, 32], strides = [1, 1]} : vector<6x32xf32> to vector<1x32xf32>
    %5 = vector.extract_strided_slice %3 {offsets = [1, 0], sizes = [1, 32], strides = [1, 1]} : vector<6x32xf32> to vector<1x32xf32>
    %6 = vector.extract_strided_slice %3 {offsets = [2, 0], sizes = [1, 32], strides = [1, 1]} : vector<6x32xf32> to vector<1x32xf32>
    %7 = vector.extract_strided_slice %3 {offsets = [3, 0], sizes = [1, 32], strides = [1, 1]} : vector<6x32xf32> to vector<1x32xf32>
    %8 = vector.extract_strided_slice %3 {offsets = [4, 0], sizes = [1, 32], strides = [1, 1]} : vector<6x32xf32> to vector<1x32xf32>
    %9 = vector.extract_strided_slice %3 {offsets = [5, 0], sizes = [1, 32], strides = [1, 1]} : vector<6x32xf32> to vector<1x32xf32>
    %c0_5 = arith.constant 0 : index
    %c0_6 = arith.constant 0 : index
    %10 = vector.load %arg5[%c0_5, %c0_6] : memref<1x32xf32, #tpu.memory_space<vmem>>, vector<1x32xf32>
    %c0_7 = arith.constant 0 : index
    %c0_8 = arith.constant 0 : index
    %11 = vector.load %arg6[%c0_7, %c0_8] : memref<1x32xf32, #tpu.memory_space<vmem>>, vector<1x32xf32>
    %cst = arith.constant dense<0.000000e+00> : vector<8xf32>
    %12 = vector.multi_reduction <add>, %1, %cst [1] : vector<8x32xf32> to vector<8xf32>
    %13 = vector.shape_cast %12 : vector<8xf32> to vector<8x1xf32>
    %cst_9 = arith.constant 3.200000e+01 : f32
    %14 = vector.broadcast %cst_9 : f32 to vector<8x1xf32>
    %15 = arith.divf %13, %14 : vector<8x1xf32>
    %16 = vector.broadcast %15 : vector<8x1xf32> to vector<8x32xf32>
    %17 = arith.subf %1, %16 : vector<8x32xf32>
    %18 = arith.mulf %17, %17 : vector<8x32xf32>
    %cst_10 = arith.constant dense<0.000000e+00> : vector<8xf32>
    %19 = vector.multi_reduction <add>, %18, %cst_10 [1] : vector<8x32xf32> to vector<8xf32>
    %20 = vector.shape_cast %19 : vector<8xf32> to vector<8x1xf32>
    %cst_11 = arith.constant 3.200000e+01 : f32
    %21 = vector.broadcast %cst_11 : f32 to vector<8x1xf32>
    %22 = arith.divf %20, %21 : vector<8x1xf32>
    %cst_12 = arith.constant 9.99999974E-6 : f32
    %23 = vector.broadcast %cst_12 : f32 to vector<8x1xf32>
    %24 = arith.addf %22, %23 : vector<8x1xf32>
    %25 = math.rsqrt %24 : vector<8x1xf32>
    %26 = vector.broadcast %25 : vector<8x1xf32> to vector<8x32xf32>
    %27 = arith.mulf %17, %26 : vector<8x32xf32>
    %28 = vector.broadcast %10 : vector<1x32xf32> to vector<8x32xf32>
    %29 = arith.mulf %27, %28 : vector<8x32xf32>
    %30 = vector.broadcast %11 : vector<1x32xf32> to vector<8x32xf32>
    %31 = arith.addf %29, %30 : vector<8x32xf32>
    %cst_13 = arith.constant 1.000000e+00 : f32
    %32 = vector.broadcast %cst_13 : f32 to vector<1x32xf32>
    %33 = arith.addf %32, %5 : vector<1x32xf32>
    %34 = vector.broadcast %33 : vector<1x32xf32> to vector<8x32xf32>
    %35 = arith.mulf %31, %34 : vector<8x32xf32>
    %36 = vector.broadcast %4 : vector<1x32xf32> to vector<8x32xf32>
    %37 = arith.addf %35, %36 : vector<8x32xf32>
    %c0_14 = arith.constant 0 : index
    %c0_15 = arith.constant 0 : index
    %38 = vector.load %arg13[%c0_14, %c0_15] : memref<32x32xf32, #tpu.memory_space<vmem>>, vector<32x32xf32>
    %cst_16 = arith.constant dense<0.000000e+00> : vector<8x32xf32>
    %39 = tpu.matmul %37, %38, %cst_16 {dimension_numbers = #tpu.dot_dimension_numbers<[1], [0], [0], [1], [0, 0, 1, 1], [], []>} : vector<8x32xf32>, vector<32x32xf32>, vector<8x32xf32> -> vector<8x32xf32>
    %c0_17 = arith.constant 0 : index
    %c0_18 = arith.constant 0 : index
    %40 = vector.load %arg14[%c0_17, %c0_18] : memref<32x32xf32, #tpu.memory_space<vmem>>, vector<32x32xf32>
    %cst_19 = arith.constant dense<0.000000e+00> : vector<8x32xf32>
    %41 = tpu.matmul %37, %40, %cst_19 {dimension_numbers = #tpu.dot_dimension_numbers<[1], [0], [0], [1], [0, 0, 1, 1], [], []>} : vector<8x32xf32>, vector<32x32xf32>, vector<8x32xf32> -> vector<8x32xf32>
    %c0_20 = arith.constant 0 : index
    %c0_21 = arith.constant 0 : index
    %42 = vector.load %arg15[%c0_20, %c0_21] : memref<32x32xf32, #tpu.memory_space<vmem>>, vector<32x32xf32>
    %cst_22 = arith.constant dense<0.000000e+00> : vector<8x32xf32>
    %43 = tpu.matmul %37, %42, %cst_22 {dimension_numbers = #tpu.dot_dimension_numbers<[1], [0], [0], [1], [0, 0, 1, 1], [], []>} : vector<8x32xf32>, vector<32x32xf32>, vector<8x32xf32> -> vector<8x32xf32>
    %c0_23 = arith.constant 0 : index
    %c0_24 = arith.constant 0 : index
    %44 = vector.load %arg7[%c0_23, %c0_24] : memref<1x32xf32, #tpu.memory_space<vmem>>, vector<1x32xf32>
    %c0_25 = arith.constant 0 : index
    %c0_26 = arith.constant 0 : index
    %45 = vector.load %arg8[%c0_25, %c0_26] : memref<1x32xf32, #tpu.memory_space<vmem>>, vector<1x32xf32>
    %cst_27 = arith.constant dense<0.000000e+00> : vector<8xf32>
    %46 = vector.multi_reduction <add>, %39, %cst_27 [1] : vector<8x32xf32> to vector<8xf32>
    %47 = vector.shape_cast %46 : vector<8xf32> to vector<8x1xf32>
    %cst_28 = arith.constant 3.200000e+01 : f32
    %48 = vector.broadcast %cst_28 : f32 to vector<8x1xf32>
    %49 = arith.divf %47, %48 : vector<8x1xf32>
    %50 = vector.broadcast %49 : vector<8x1xf32> to vector<8x32xf32>
    %51 = arith.subf %39, %50 : vector<8x32xf32>
    %52 = arith.mulf %51, %51 : vector<8x32xf32>
    %cst_29 = arith.constant dense<0.000000e+00> : vector<8xf32>
    %53 = vector.multi_reduction <add>, %52, %cst_29 [1] : vector<8x32xf32> to vector<8xf32>
    %54 = vector.shape_cast %53 : vector<8xf32> to vector<8x1xf32>
    %cst_30 = arith.constant 3.200000e+01 : f32
    %55 = vector.broadcast %cst_30 : f32 to vector<8x1xf32>
    %56 = arith.divf %54, %55 : vector<8x1xf32>
    %cst_31 = arith.constant 9.99999974E-6 : f32
    %57 = vector.broadcast %cst_31 : f32 to vector<8x1xf32>
    %58 = arith.addf %56, %57 : vector<8x1xf32>
    %59 = math.rsqrt %58 : vector<8x1xf32>
    %60 = vector.broadcast %59 : vector<8x1xf32> to vector<8x32xf32>
    %61 = arith.mulf %51, %60 : vector<8x32xf32>
    %62 = vector.broadcast %44 : vector<1x32xf32> to vector<8x32xf32>
    %63 = arith.mulf %61, %62 : vector<8x32xf32>
    %64 = vector.broadcast %45 : vector<1x32xf32> to vector<8x32xf32>
    %65 = arith.addf %63, %64 : vector<8x32xf32>
    %c0_32 = arith.constant 0 : index
    %c0_33 = arith.constant 0 : index
    %66 = vector.load %arg9[%c0_32, %c0_33] : memref<1x32xf32, #tpu.memory_space<vmem>>, vector<1x32xf32>
    %c0_34 = arith.constant 0 : index
    %c0_35 = arith.constant 0 : index
    %67 = vector.load %arg10[%c0_34, %c0_35] : memref<1x32xf32, #tpu.memory_space<vmem>>, vector<1x32xf32>
    %cst_36 = arith.constant dense<0.000000e+00> : vector<8xf32>
    %68 = vector.multi_reduction <add>, %41, %cst_36 [1] : vector<8x32xf32> to vector<8xf32>
    %69 = vector.shape_cast %68 : vector<8xf32> to vector<8x1xf32>
    %cst_37 = arith.constant 3.200000e+01 : f32
    %70 = vector.broadcast %cst_37 : f32 to vector<8x1xf32>
    %71 = arith.divf %69, %70 : vector<8x1xf32>
    %72 = vector.broadcast %71 : vector<8x1xf32> to vector<8x32xf32>
    %73 = arith.subf %41, %72 : vector<8x32xf32>
    %74 = arith.mulf %73, %73 : vector<8x32xf32>
    %cst_38 = arith.constant dense<0.000000e+00> : vector<8xf32>
    %75 = vector.multi_reduction <add>, %74, %cst_38 [1] : vector<8x32xf32> to vector<8xf32>
    %76 = vector.shape_cast %75 : vector<8xf32> to vector<8x1xf32>
    %cst_39 = arith.constant 3.200000e+01 : f32
    %77 = vector.broadcast %cst_39 : f32 to vector<8x1xf32>
    %78 = arith.divf %76, %77 : vector<8x1xf32>
    %cst_40 = arith.constant 9.99999974E-6 : f32
    %79 = vector.broadcast %cst_40 : f32 to vector<8x1xf32>
    %80 = arith.addf %78, %79 : vector<8x1xf32>
    %81 = math.rsqrt %80 : vector<8x1xf32>
    %82 = vector.broadcast %81 : vector<8x1xf32> to vector<8x32xf32>
    %83 = arith.mulf %73, %82 : vector<8x32xf32>
    %84 = vector.broadcast %66 : vector<1x32xf32> to vector<8x32xf32>
    %85 = arith.mulf %83, %84 : vector<8x32xf32>
    %86 = vector.broadcast %67 : vector<1x32xf32> to vector<8x32xf32>
    %87 = arith.addf %85, %86 : vector<8x32xf32>
    %c0_41 = arith.constant 0 : index
    %c0_42 = arith.constant 0 : index
    %88 = vector.load %arg22[%c0_41, %c0_42] : memref<8x32xf32, #tpu.memory_space<vmem>>, vector<8x32xf32>
    tpu.vector_store %arg22[%c0_41, %c0_42], %43 {strides = array<i32>} : memref<8x32xf32, #tpu.memory_space<vmem>>, vector<8x32xf32>,
    %c0_43 = arith.constant 0 : index
    %c0_44 = arith.constant 0 : index
    %89 = vector.load %arg3[%c0_43, %c0_44] : memref<8x4xf32, #tpu.memory_space<vmem>>, vector<8x4xf32>
    %c0_45 = arith.constant 0 : index
    %c0_46 = arith.constant 0 : index
    %90 = vector.load %arg4[%c0_45, %c0_46] : memref<8x4xf32, #tpu.memory_space<vmem>>, vector<8x4xf32>
    %91 = vector.extract_strided_slice %65 {offsets = [0, 0], sizes = [8, 4], strides = [1, 1]} : vector<8x32xf32> to vector<8x4xf32>
    %92 = vector.extract_strided_slice %65 {offsets = [0, 4], sizes = [8, 4], strides = [1, 1]} : vector<8x32xf32> to vector<8x4xf32>
    %93 = vector.extract_strided_slice %87 {offsets = [0, 0], sizes = [8, 4], strides = [1, 1]} : vector<8x32xf32> to vector<8x4xf32>
    %94 = vector.extract_strided_slice %87 {offsets = [0, 4], sizes = [8, 4], strides = [1, 1]} : vector<8x32xf32> to vector<8x4xf32>
    %95 = arith.mulf %91, %90 : vector<8x4xf32>
    %96 = arith.mulf %92, %89 : vector<8x4xf32>
    %97 = arith.subf %95, %96 : vector<8x4xf32>
    %cst_47 = arith.constant 0.353553385 : f32
    %98 = vector.broadcast %cst_47 : f32 to vector<8x4xf32>
    %99 = arith.mulf %97, %98 : vector<8x4xf32>
    %c0_48 = arith.constant 0 : index
    %c0_49 = arith.constant 0 : index
    %100 = vector.load %arg20[%c0_48, %c0_49] : memref<8x32xf32, #tpu.memory_space<vmem>>, vector<8x4xf32>
    tpu.vector_store %arg20[%c0_48, %c0_49], %99 {strides = array<i32>} : memref<8x32xf32, #tpu.memory_space<vmem>>, vector<8x4xf32>,
    %101 = arith.mulf %92, %90 : vector<8x4xf32>
    %102 = arith.mulf %91, %89 : vector<8x4xf32>
    %103 = arith.addf %101, %102 : vector<8x4xf32>
    %cst_50 = arith.constant 0.353553385 : f32
    %104 = vector.broadcast %cst_50 : f32 to vector<8x4xf32>
    %105 = arith.mulf %103, %104 : vector<8x4xf32>
    %c0_51 = arith.constant 0 : index
    %c4 = arith.constant 4 : index
    %106 = vector.load %arg20[%c0_51, %c4] : memref<8x32xf32, #tpu.memory_space<vmem>>, vector<8x4xf32>
    tpu.vector_store %arg20[%c0_51, %c4], %105 {strides = array<i32>} : memref<8x32xf32, #tpu.memory_space<vmem>>, vector<8x4xf32>,
    %107 = arith.mulf %93, %90 : vector<8x4xf32>
    %108 = arith.mulf %94, %89 : vector<8x4xf32>
    %109 = arith.subf %107, %108 : vector<8x4xf32>
    %c0_52 = arith.constant 0 : index
    %c0_53 = arith.constant 0 : index
    %110 = vector.load %arg21[%c0_52, %c0_53] : memref<8x32xf32, #tpu.memory_space<vmem>>, vector<8x4xf32>
    tpu.vector_store %arg21[%c0_52, %c0_53], %109 {strides = array<i32>} : memref<8x32xf32, #tpu.memory_space<vmem>>, vector<8x4xf32>,
    %111 = arith.mulf %94, %90 : vector<8x4xf32>
    %112 = arith.mulf %93, %89 : vector<8x4xf32>
    %113 = arith.addf %111, %112 : vector<8x4xf32>
    %c0_54 = arith.constant 0 : index
    %c4_55 = arith.constant 4 : index
    %114 = vector.load %arg21[%c0_54, %c4_55] : memref<8x32xf32, #tpu.memory_space<vmem>>, vector<8x4xf32>
    tpu.vector_store %arg21[%c0_54, %c4_55], %113 {strides = array<i32>} : memref<8x32xf32, #tpu.memory_space<vmem>>, vector<8x4xf32>,
    %115 = vector.extract_strided_slice %65 {offsets = [0, 8], sizes = [8, 4], strides = [1, 1]} : vector<8x32xf32> to vector<8x4xf32>
    %116 = vector.extract_strided_slice %65 {offsets = [0, 12], sizes = [8, 4], strides = [1, 1]} : vector<8x32xf32> to vector<8x4xf32>
    %117 = vector.extract_strided_slice %87 {offsets = [0, 8], sizes = [8, 4], strides = [1, 1]} : vector<8x32xf32> to vector<8x4xf32>
    %118 = vector.extract_strided_slice %87 {offsets = [0, 12], sizes = [8, 4], strides = [1, 1]} : vector<8x32xf32> to vector<8x4xf32>
    %119 = arith.mulf %115, %90 : vector<8x4xf32>
    %120 = arith.mulf %116, %89 : vector<8x4xf32>
    %121 = arith.subf %119, %120 : vector<8x4xf32>
    %cst_56 = arith.constant 0.353553385 : f32
    %122 = vector.broadcast %cst_56 : f32 to vector<8x4xf32>
    %123 = arith.mulf %121, %122 : vector<8x4xf32>
    %c0_57 = arith.constant 0 : index
    %c8 = arith.constant 8 : index
    %124 = vector.load %arg20[%c0_57, %c8] : memref<8x32xf32, #tpu.memory_space<vmem>>, vector<8x4xf32>
    tpu.vector_store %arg20[%c0_57, %c8], %123 {strides = array<i32>} : memref<8x32xf32, #tpu.memory_space<vmem>>, vector<8x4xf32>,
    %125 = arith.mulf %116, %90 : vector<8x4xf32>
    %126 = arith.mulf %115, %89 : vector<8x4xf32>
    %127 = arith.addf %125, %126 : vector<8x4xf32>
    %cst_58 = arith.constant 0.353553385 : f32
    %128 = vector.broadcast %cst_58 : f32 to vector<8x4xf32>
    %129 = arith.mulf %127, %128 : vector<8x4xf32>
    %c0_59 = arith.constant 0 : index
    %c12 = arith.constant 12 : index
    %130 = vector.load %arg20[%c0_59, %c12] : memref<8x32xf32, #tpu.memory_space<vmem>>, vector<8x4xf32>
    tpu.vector_store %arg20[%c0_59, %c12], %129 {strides = array<i32>} : memref<8x32xf32, #tpu.memory_space<vmem>>, vector<8x4xf32>,
    %131 = arith.mulf %117, %90 : vector<8x4xf32>
    %132 = arith.mulf %118, %89 : vector<8x4xf32>
    %133 = arith.subf %131, %132 : vector<8x4xf32>
    %c0_60 = arith.constant 0 : index
    %c8_61 = arith.constant 8 : index
    %134 = vector.load %arg21[%c0_60, %c8_61] : memref<8x32xf32, #tpu.memory_space<vmem>>, vector<8x4xf32>
    tpu.vector_store %arg21[%c0_60, %c8_61], %133 {strides = array<i32>} : memref<8x32xf32, #tpu.memory_space<vmem>>, vector<8x4xf32>,
    %135 = arith.mulf %118, %90 : vector<8x4xf32>
    %136 = arith.mulf %117, %89 : vector<8x4xf32>
    %137 = arith.addf %135, %136 : vector<8x4xf32>
    %c0_62 = arith.constant 0 : index
    %c12_63 = arith.constant 12 : index
    %138 = vector.load %arg21[%c0_62, %c12_63] : memref<8x32xf32, #tpu.memory_space<vmem>>, vector<8x4xf32>
    tpu.vector_store %arg21[%c0_62, %c12_63], %137 {strides = array<i32>} : memref<8x32xf32, #tpu.memory_space<vmem>>, vector<8x4xf32>,
    %139 = vector.extract_strided_slice %65 {offsets = [0, 16], sizes = [8, 4], strides = [1, 1]} : vector<8x32xf32> to vector<8x4xf32>
    %140 = vector.extract_strided_slice %65 {offsets = [0, 20], sizes = [8, 4], strides = [1, 1]} : vector<8x32xf32> to vector<8x4xf32>
    %141 = vector.extract_strided_slice %87 {offsets = [0, 16], sizes = [8, 4], strides = [1, 1]} : vector<8x32xf32> to vector<8x4xf32>
    %142 = vector.extract_strided_slice %87 {offsets = [0, 20], sizes = [8, 4], strides = [1, 1]} : vector<8x32xf32> to vector<8x4xf32>
    %143 = arith.mulf %139, %90 : vector<8x4xf32>
    %144 = arith.mulf %140, %89 : vector<8x4xf32>
    %145 = arith.subf %143, %144 : vector<8x4xf32>
    %cst_64 = arith.constant 0.353553385 : f32
    %146 = vector.broadcast %cst_64 : f32 to vector<8x4xf32>
    %147 = arith.mulf %145, %146 : vector<8x4xf32>
    %c0_65 = arith.constant 0 : index
    %c16 = arith.constant 16 : index
    %148 = vector.load %arg20[%c0_65, %c16] : memref<8x32xf32, #tpu.memory_space<vmem>>, vector<8x4xf32>
    tpu.vector_store %arg20[%c0_65, %c16], %147 {strides = array<i32>} : memref<8x32xf32, #tpu.memory_space<vmem>>, vector<8x4xf32>,
    %149 = arith.mulf %140, %90 : vector<8x4xf32>
    %150 = arith.mulf %139, %89 : vector<8x4xf32>
    %151 = arith.addf %149, %150 : vector<8x4xf32>
    %cst_66 = arith.constant 0.353553385 : f32
    %152 = vector.broadcast %cst_66 : f32 to vector<8x4xf32>
    %153 = arith.mulf %151, %152 : vector<8x4xf32>
    %c0_67 = arith.constant 0 : index
    %c20 = arith.constant 20 : index
    %154 = vector.load %arg20[%c0_67, %c20] : memref<8x32xf32, #tpu.memory_space<vmem>>, vector<8x4xf32>
    tpu.vector_store %arg20[%c0_67, %c20], %153 {strides = array<i32>} : memref<8x32xf32, #tpu.memory_space<vmem>>, vector<8x4xf32>,
    %155 = arith.mulf %141, %90 : vector<8x4xf32>
    %156 = arith.mulf %142, %89 : vector<8x4xf32>
    %157 = arith.subf %155, %156 : vector<8x4xf32>
    %c0_68 = arith.constant 0 : index
    %c16_69 = arith.constant 16 : index
    %158 = vector.load %arg21[%c0_68, %c16_69] : memref<8x32xf32, #tpu.memory_space<vmem>>, vector<8x4xf32>
    tpu.vector_store %arg21[%c0_68, %c16_69], %157 {strides = array<i32>} : memref<8x32xf32, #tpu.memory_space<vmem>>, vector<8x4xf32>,
    %159 = arith.mulf %142, %90 : vector<8x4xf32>
    %160 = arith.mulf %141, %89 : vector<8x4xf32>
    %161 = arith.addf %159, %160 : vector<8x4xf32>
    %c0_70 = arith.constant 0 : index
    %c20_71 = arith.constant 20 : index
    %162 = vector.load %arg21[%c0_70, %c20_71] : memref<8x32xf32, #tpu.memory_space<vmem>>, vector<8x4xf32>
    tpu.vector_store %arg21[%c0_70, %c20_71], %161 {strides = array<i32>} : memref<8x32xf32, #tpu.memory_space<vmem>>, vector<8x4xf32>,
    %163 = vector.extract_strided_slice %65 {offsets = [0, 24], sizes = [8, 4], strides = [1, 1]} : vector<8x32xf32> to vector<8x4xf32>
    %164 = vector.extract_strided_slice %65 {offsets = [0, 28], sizes = [8, 4], strides = [1, 1]} : vector<8x32xf32> to vector<8x4xf32>
    %165 = vector.extract_strided_slice %87 {offsets = [0, 24], sizes = [8, 4], strides = [1, 1]} : vector<8x32xf32> to vector<8x4xf32>
    %166 = vector.extract_strided_slice %87 {offsets = [0, 28], sizes = [8, 4], strides = [1, 1]} : vector<8x32xf32> to vector<8x4xf32>
    %167 = arith.mulf %163, %90 : vector<8x4xf32>
    %168 = arith.mulf %164, %89 : vector<8x4xf32>
    %169 = arith.subf %167, %168 : vector<8x4xf32>
    %cst_72 = arith.constant 0.353553385 : f32
    %170 = vector.broadcast %cst_72 : f32 to vector<8x4xf32>
    %171 = arith.mulf %169, %170 : vector<8x4xf32>
    %c0_73 = arith.constant 0 : index
    %c24 = arith.constant 24 : index
    %172 = vector.load %arg20[%c0_73, %c24] : memref<8x32xf32, #tpu.memory_space<vmem>>, vector<8x4xf32>
    tpu.vector_store %arg20[%c0_73, %c24], %171 {strides = array<i32>} : memref<8x32xf32, #tpu.memory_space<vmem>>, vector<8x4xf32>,
    %173 = arith.mulf %164, %90 : vector<8x4xf32>
    %174 = arith.mulf %163, %89 : vector<8x4xf32>
    %175 = arith.addf %173, %174 : vector<8x4xf32>
    %cst_74 = arith.constant 0.353553385 : f32
    %176 = vector.broadcast %cst_74 : f32 to vector<8x4xf32>
    %177 = arith.mulf %175, %176 : vector<8x4xf32>
    %c0_75 = arith.constant 0 : index
    %c28 = arith.constant 28 : index
    %178 = vector.load %arg20[%c0_75, %c28] : memref<8x32xf32, #tpu.memory_space<vmem>>, vector<8x4xf32>
    tpu.vector_store %arg20[%c0_75, %c28], %177 {strides = array<i32>} : memref<8x32xf32, #tpu.memory_space<vmem>>, vector<8x4xf32>,
    %179 = arith.mulf %165, %90 : vector<8x4xf32>
    %180 = arith.mulf %166, %89 : vector<8x4xf32>
    %181 = arith.subf %179, %180 : vector<8x4xf32>
    %c0_76 = arith.constant 0 : index
    %c24_77 = arith.constant 24 : index
    %182 = vector.load %arg21[%c0_76, %c24_77] : memref<8x32xf32, #tpu.memory_space<vmem>>, vector<8x4xf32>
    tpu.vector_store %arg21[%c0_76, %c24_77], %181 {strides = array<i32>} : memref<8x32xf32, #tpu.memory_space<vmem>>, vector<8x4xf32>,
    %183 = arith.mulf %166, %90 : vector<8x4xf32>
    %184 = arith.mulf %165, %89 : vector<8x4xf32>
    %185 = arith.addf %183, %184 : vector<8x4xf32>
    %c0_78 = arith.constant 0 : index
    %c28_79 = arith.constant 28 : index
    %186 = vector.load %arg21[%c0_78, %c28_79] : memref<8x32xf32, #tpu.memory_space<vmem>>, vector<8x4xf32>
    tpu.vector_store %arg21[%c0_78, %c28_79], %185 {strides = array<i32>} : memref<8x32xf32, #tpu.memory_space<vmem>>, vector<8x4xf32>,
    %c0_i32 = arith.constant 0 : i32
    %c8_i32 = arith.constant 8 : i32
    %187 = arith.muli %c0_i32, %c8_i32 : i32
    %188 = tpu.assume_multiple %187, 8 : i32
    %189 = arith.index_cast %188 : i32 to index
    %c0_80 = arith.constant 0 : index
    %190 = vector.load %arg20[%189, %c0_80] : memref<8x32xf32, #tpu.memory_space<vmem>>, vector<8x8xf32>
    %c0_81 = arith.constant 0 : index
    %c0_82 = arith.constant 0 : index
    %191 = vector.load %arg21[%c0_81, %c0_82] : memref<8x32xf32, #tpu.memory_space<vmem>>, vector<8x8xf32>
    %cst_83 = arith.constant dense<0.000000e+00> : vector<8x8xf32>
    %192 = tpu.matmul %190, %191, %cst_83 {dimension_numbers = #tpu.dot_dimension_numbers<[1], [1], [0], [0], [0, 0, 1, 0], [], []>} : vector<8x8xf32>, vector<8x8xf32>, vector<8x8xf32> -> vector<8x8xf32>
    %cst_84 = arith.constant dense<0xFF800000> : vector<8xf32>
    %193 = vector.multi_reduction <maximumf>, %192, %cst_84 [1] : vector<8x8xf32> to vector<8xf32>
    %194 = vector.shape_cast %193 : vector<8xf32> to vector<8x1xf32>
    %195 = vector.broadcast %194 : vector<8x1xf32> to vector<8x8xf32>
    %196 = arith.subf %192, %195 : vector<8x8xf32>
    %197 = math.exp %196 : vector<8x8xf32>
    %cst_85 = arith.constant dense<0.000000e+00> : vector<8xf32>
    %198 = vector.multi_reduction <add>, %197, %cst_85 [1] : vector<8x8xf32> to vector<8xf32>
    %199 = vector.shape_cast %198 : vector<8xf32> to vector<8x1xf32>
    %cst_86 = arith.constant 1.000000e+00 : f32
    %200 = vector.broadcast %cst_86 : f32 to vector<8x1xf32>
    %201 = arith.divf %200, %199 : vector<8x1xf32>
    %202 = vector.broadcast %201 : vector<8x1xf32> to vector<8x8xf32>
    %203 = arith.mulf %197, %202 : vector<8x8xf32>
    %c0_87 = arith.constant 0 : index
    %c0_88 = arith.constant 0 : index
    %204 = vector.load %arg22[%c0_87, %c0_88] : memref<8x32xf32, #tpu.memory_space<vmem>>, vector<8x8xf32>
    %cst_89 = arith.constant dense<0.000000e+00> : vector<8x8xf32>
    %205 = tpu.matmul %203, %204, %cst_89 {dimension_numbers = #tpu.dot_dimension_numbers<[1], [0], [0], [1], [0, 0, 1, 1], [], []>} : vector<8x8xf32>, vector<8x8xf32>, vector<8x8xf32> -> vector<8x8xf32>
    %206 = arith.index_cast %188 : i32 to index
    %c0_90 = arith.constant 0 : index
    %207 = vector.load %arg23[%206, %c0_90] : memref<8x32xf32, #tpu.memory_space<vmem>>, vector<8x8xf32>
    tpu.vector_store %arg23[%206, %c0_90], %205 {strides = array<i32>} : memref<8x32xf32, #tpu.memory_space<vmem>>, vector<8x8xf32>,
    %208 = arith.index_cast %188 : i32 to index
    %c8_91 = arith.constant 8 : index
    %209 = vector.load %arg20[%208, %c8_91] : memref<8x32xf32, #tpu.memory_space<vmem>>, vector<8x8xf32>
    %c0_92 = arith.constant 0 : index
    %c8_93 = arith.constant 8 : index
    %210 = vector.load %arg21[%c0_92, %c8_93] : memref<8x32xf32, #tpu.memory_space<vmem>>, vector<8x8xf32>
    %cst_94 = arith.constant dense<0.000000e+00> : vector<8x8xf32>
    %211 = tpu.matmul %209, %210, %cst_94 {dimension_numbers = #tpu.dot_dimension_numbers<[1], [1], [0], [0], [0, 0, 1, 0], [], []>} : vector<8x8xf32>, vector<8x8xf32>, vector<8x8xf32> -> vector<8x8xf32>
    %cst_95 = arith.constant dense<0xFF800000> : vector<8xf32>
    %212 = vector.multi_reduction <maximumf>, %211, %cst_95 [1] : vector<8x8xf32> to vector<8xf32>
    %213 = vector.shape_cast %212 : vector<8xf32> to vector<8x1xf32>
    %214 = vector.broadcast %213 : vector<8x1xf32> to vector<8x8xf32>
    %215 = arith.subf %211, %214 : vector<8x8xf32>
    %216 = math.exp %215 : vector<8x8xf32>
    %cst_96 = arith.constant dense<0.000000e+00> : vector<8xf32>
    %217 = vector.multi_reduction <add>, %216, %cst_96 [1] : vector<8x8xf32> to vector<8xf32>
    %218 = vector.shape_cast %217 : vector<8xf32> to vector<8x1xf32>
    %cst_97 = arith.constant 1.000000e+00 : f32
    %219 = vector.broadcast %cst_97 : f32 to vector<8x1xf32>
    %220 = arith.divf %219, %218 : vector<8x1xf32>
    %221 = vector.broadcast %220 : vector<8x1xf32> to vector<8x8xf32>
    %222 = arith.mulf %216, %221 : vector<8x8xf32>
    %c0_98 = arith.constant 0 : index
    %c8_99 = arith.constant 8 : index
    %223 = vector.load %arg22[%c0_98, %c8_99] : memref<8x32xf32, #tpu.memory_space<vmem>>, vector<8x8xf32>
    %cst_100 = arith.constant dense<0.000000e+00> : vector<8x8xf32>
    %224 = tpu.matmul %222, %223, %cst_100 {dimension_numbers = #tpu.dot_dimension_numbers<[1], [0], [0], [1], [0, 0, 1, 1], [], []>} : vector<8x8xf32>, vector<8x8xf32>, vector<8x8xf32> -> vector<8x8xf32>
    %225 = arith.index_cast %188 : i32 to index
    %c8_101 = arith.constant 8 : index
    %226 = vector.load %arg23[%225, %c8_101] : memref<8x32xf32, #tpu.memory_space<vmem>>, vector<8x8xf32>
    tpu.vector_store %arg23[%225, %c8_101], %224 {strides = array<i32>} : memref<8x32xf32, #tpu.memory_space<vmem>>, vector<8x8xf32>,
    %227 = arith.index_cast %188 : i32 to index
    %c16_102 = arith.constant 16 : index
    %228 = vector.load %arg20[%227, %c16_102] : memref<8x32xf32, #tpu.memory_space<vmem>>, vector<8x8xf32>
    %c0_103 = arith.constant 0 : index
    %c16_104 = arith.constant 16 : index
    %229 = vector.load %arg21[%c0_103, %c16_104] : memref<8x32xf32, #tpu.memory_space<vmem>>, vector<8x8xf32>
    %cst_105 = arith.constant dense<0.000000e+00> : vector<8x8xf32>
    %230 = tpu.matmul %228, %229, %cst_105 {dimension_numbers = #tpu.dot_dimension_numbers<[1], [1], [0], [0], [0, 0, 1, 0], [], []>} : vector<8x8xf32>, vector<8x8xf32>, vector<8x8xf32> -> vector<8x8xf32>
    %cst_106 = arith.constant dense<0xFF800000> : vector<8xf32>
    %231 = vector.multi_reduction <maximumf>, %230, %cst_106 [1] : vector<8x8xf32> to vector<8xf32>
    %232 = vector.shape_cast %231 : vector<8xf32> to vector<8x1xf32>
    %233 = vector.broadcast %232 : vector<8x1xf32> to vector<8x8xf32>
    %234 = arith.subf %230, %233 : vector<8x8xf32>
    %235 = math.exp %234 : vector<8x8xf32>
    %cst_107 = arith.constant dense<0.000000e+00> : vector<8xf32>
    %236 = vector.multi_reduction <add>, %235, %cst_107 [1] : vector<8x8xf32> to vector<8xf32>
    %237 = vector.shape_cast %236 : vector<8xf32> to vector<8x1xf32>
    %cst_108 = arith.constant 1.000000e+00 : f32
    %238 = vector.broadcast %cst_108 : f32 to vector<8x1xf32>
    %239 = arith.divf %238, %237 : vector<8x1xf32>
    %240 = vector.broadcast %239 : vector<8x1xf32> to vector<8x8xf32>
    %241 = arith.mulf %235, %240 : vector<8x8xf32>
    %c0_109 = arith.constant 0 : index
    %c16_110 = arith.constant 16 : index
    %242 = vector.load %arg22[%c0_109, %c16_110] : memref<8x32xf32, #tpu.memory_space<vmem>>, vector<8x8xf32>
    %cst_111 = arith.constant dense<0.000000e+00> : vector<8x8xf32>
    %243 = tpu.matmul %241, %242, %cst_111 {dimension_numbers = #tpu.dot_dimension_numbers<[1], [0], [0], [1], [0, 0, 1, 1], [], []>} : vector<8x8xf32>, vector<8x8xf32>, vector<8x8xf32> -> vector<8x8xf32>
    %244 = arith.index_cast %188 : i32 to index
    %c16_112 = arith.constant 16 : index
    %245 = vector.load %arg23[%244, %c16_112] : memref<8x32xf32, #tpu.memory_space<vmem>>, vector<8x8xf32>
    tpu.vector_store %arg23[%244, %c16_112], %243 {strides = array<i32>} : memref<8x32xf32, #tpu.memory_space<vmem>>, vector<8x8xf32>,
    %246 = arith.index_cast %188 : i32 to index
    %c24_113 = arith.constant 24 : index
    %247 = vector.load %arg20[%246, %c24_113] : memref<8x32xf32, #tpu.memory_space<vmem>>, vector<8x8xf32>
    %c0_114 = arith.constant 0 : index
    %c24_115 = arith.constant 24 : index
    %248 = vector.load %arg21[%c0_114, %c24_115] : memref<8x32xf32, #tpu.memory_space<vmem>>, vector<8x8xf32>
    %cst_116 = arith.constant dense<0.000000e+00> : vector<8x8xf32>
    %249 = tpu.matmul %247, %248, %cst_116 {dimension_numbers = #tpu.dot_dimension_numbers<[1], [1], [0], [0], [0, 0, 1, 0], [], []>} : vector<8x8xf32>, vector<8x8xf32>, vector<8x8xf32> -> vector<8x8xf32>
    %cst_117 = arith.constant dense<0xFF800000> : vector<8xf32>
    %250 = vector.multi_reduction <maximumf>, %249, %cst_117 [1] : vector<8x8xf32> to vector<8xf32>
    %251 = vector.shape_cast %250 : vector<8xf32> to vector<8x1xf32>
    %252 = vector.broadcast %251 : vector<8x1xf32> to vector<8x8xf32>
    %253 = arith.subf %249, %252 : vector<8x8xf32>
    %254 = math.exp %253 : vector<8x8xf32>
    %cst_118 = arith.constant dense<0.000000e+00> : vector<8xf32>
    %255 = vector.multi_reduction <add>, %254, %cst_118 [1] : vector<8x8xf32> to vector<8xf32>
    %256 = vector.shape_cast %255 : vector<8xf32> to vector<8x1xf32>
    %cst_119 = arith.constant 1.000000e+00 : f32
    %257 = vector.broadcast %cst_119 : f32 to vector<8x1xf32>
    %258 = arith.divf %257, %256 : vector<8x1xf32>
    %259 = vector.broadcast %258 : vector<8x1xf32> to vector<8x8xf32>
    %260 = arith.mulf %254, %259 : vector<8x8xf32>
    %c0_120 = arith.constant 0 : index
    %c24_121 = arith.constant 24 : index
    %261 = vector.load %arg22[%c0_120, %c24_121] : memref<8x32xf32, #tpu.memory_space<vmem>>, vector<8x8xf32>
    %cst_122 = arith.constant dense<0.000000e+00> : vector<8x8xf32>
    %262 = tpu.matmul %260, %261, %cst_122 {dimension_numbers = #tpu.dot_dimension_numbers<[1], [0], [0], [1], [0, 0, 1, 1], [], []>} : vector<8x8xf32>, vector<8x8xf32>, vector<8x8xf32> -> vector<8x8xf32>
    %263 = arith.index_cast %188 : i32 to index
    %c24_123 = arith.constant 24 : index
    %264 = vector.load %arg23[%263, %c24_123] : memref<8x32xf32, #tpu.memory_space<vmem>>, vector<8x8xf32>
    tpu.vector_store %arg23[%263, %c24_123], %262 {strides = array<i32>} : memref<8x32xf32, #tpu.memory_space<vmem>>, vector<8x8xf32>,
    %c1_i32 = arith.constant 1 : i32
    %c0_124 = arith.constant 0 : index
    %c0_125 = arith.constant 0 : index
    %265 = vector.load %arg23[%c0_124, %c0_125] : memref<8x32xf32, #tpu.memory_space<vmem>>, vector<8x32xf32>
    %c0_126 = arith.constant 0 : index
    %c0_127 = arith.constant 0 : index
    %266 = vector.load %arg16[%c0_126, %c0_127] : memref<32x32xf32, #tpu.memory_space<vmem>>, vector<32x32xf32>
    %cst_128 = arith.constant dense<0.000000e+00> : vector<8x32xf32>
    %267 = tpu.matmul %265, %266, %cst_128 {dimension_numbers = #tpu.dot_dimension_numbers<[1], [0], [0], [1], [0, 0, 1, 1], [], []>} : vector<8x32xf32>, vector<32x32xf32>, vector<8x32xf32> -> vector<8x32xf32>
    %268 = vector.broadcast %6 : vector<1x32xf32> to vector<8x32xf32>
    %269 = arith.mulf %268, %267 : vector<8x32xf32>
    %270 = arith.addf %1, %269 : vector<8x32xf32>
    %c0_129 = arith.constant 0 : index
    %c0_130 = arith.constant 0 : index
    %271 = vector.load %arg11[%c0_129, %c0_130] : memref<1x32xf32, #tpu.memory_space<vmem>>, vector<1x32xf32>
    %c0_131 = arith.constant 0 : index
    %c0_132 = arith.constant 0 : index
    %272 = vector.load %arg12[%c0_131, %c0_132] : memref<1x32xf32, #tpu.memory_space<vmem>>, vector<1x32xf32>
    %cst_133 = arith.constant dense<0.000000e+00> : vector<8xf32>
    %273 = vector.multi_reduction <add>, %270, %cst_133 [1] : vector<8x32xf32> to vector<8xf32>
    %274 = vector.shape_cast %273 : vector<8xf32> to vector<8x1xf32>
    %cst_134 = arith.constant 3.200000e+01 : f32
    %275 = vector.broadcast %cst_134 : f32 to vector<8x1xf32>
    %276 = arith.divf %274, %275 : vector<8x1xf32>
    %277 = vector.broadcast %276 : vector<8x1xf32> to vector<8x32xf32>
    %278 = arith.subf %270, %277 : vector<8x32xf32>
    %279 = arith.mulf %278, %278 : vector<8x32xf32>
    %cst_135 = arith.constant dense<0.000000e+00> : vector<8xf32>
    %280 = vector.multi_reduction <add>, %279, %cst_135 [1] : vector<8x32xf32> to vector<8xf32>
    %281 = vector.shape_cast %280 : vector<8xf32> to vector<8x1xf32>
    %cst_136 = arith.constant 3.200000e+01 : f32
    %282 = vector.broadcast %cst_136 : f32 to vector<8x1xf32>
    %283 = arith.divf %281, %282 : vector<8x1xf32>
    %cst_137 = arith.constant 9.99999974E-6 : f32
    %284 = vector.broadcast %cst_137 : f32 to vector<8x1xf32>
    %285 = arith.addf %283, %284 : vector<8x1xf32>
    %286 = math.rsqrt %285 : vector<8x1xf32>
    %287 = vector.broadcast %286 : vector<8x1xf32> to vector<8x32xf32>
    %288 = arith.mulf %278, %287 : vector<8x32xf32>
    %289 = vector.broadcast %271 : vector<1x32xf32> to vector<8x32xf32>
    %290 = arith.mulf %288, %289 : vector<8x32xf32>
    %291 = vector.broadcast %272 : vector<1x32xf32> to vector<8x32xf32>
    %292 = arith.addf %290, %291 : vector<8x32xf32>
    %cst_138 = arith.constant 1.000000e+00 : f32
    %293 = vector.broadcast %cst_138 : f32 to vector<1x32xf32>
    %294 = arith.addf %293, %8 : vector<1x32xf32>
    %295 = vector.broadcast %294 : vector<1x32xf32> to vector<8x32xf32>
    %296 = arith.mulf %292, %295 : vector<8x32xf32>
    %297 = vector.broadcast %7 : vector<1x32xf32> to vector<8x32xf32>
    %298 = arith.addf %296, %297 : vector<8x32xf32>
    %c0_139 = arith.constant 0 : index
    %c0_140 = arith.constant 0 : index
    %299 = vector.load %arg17[%c0_139, %c0_140] : memref<32x192xf32, #tpu.memory_space<vmem>>, vector<32x192xf32>
    %cst_141 = arith.constant dense<0.000000e+00> : vector<8x192xf32>
    %300 = tpu.matmul %298, %299, %cst_141 {dimension_numbers = #tpu.dot_dimension_numbers<[1], [0], [0], [1], [0, 0, 1, 1], [], []>} : vector<8x32xf32>, vector<32x192xf32>, vector<8x192xf32> -> vector<8x192xf32>
    %301 = vector.extract_strided_slice %300 {offsets = [0, 0], sizes = [8, 96], strides = [1, 1]} : vector<8x192xf32> to vector<8x96xf32>
    %302 = vector.extract_strided_slice %300 {offsets = [0, 96], sizes = [8, 96], strides = [1, 1]} : vector<8x192xf32> to vector<8x96xf32>
    %303 = arith.negf %301 : vector<8x96xf32>
    %304 = math.exp %303 : vector<8x96xf32>
    %cst_142 = arith.constant 1.000000e+00 : f32
    %305 = vector.broadcast %cst_142 : f32 to vector<8x96xf32>
    %306 = arith.addf %305, %304 : vector<8x96xf32>
    %307 = arith.divf %305, %306 : vector<8x96xf32>
    %308 = arith.mulf %301, %307 : vector<8x96xf32>
    %309 = arith.mulf %308, %302 : vector<8x96xf32>
    %c0_143 = arith.constant 0 : index
    %c0_144 = arith.constant 0 : index
    %310 = vector.load %arg18[%c0_143, %c0_144] : memref<96x32xf32, #tpu.memory_space<vmem>>, vector<96x32xf32>
    %cst_145 = arith.constant dense<0.000000e+00> : vector<8x32xf32>
    %311 = tpu.matmul %309, %310, %cst_145 {dimension_numbers = #tpu.dot_dimension_numbers<[1], [0], [0], [1], [0, 0, 1, 1], [], []>} : vector<8x96xf32>, vector<96x32xf32>, vector<8x32xf32> -> vector<8x32xf32>
    %312 = vector.broadcast %9 : vector<1x32xf32> to vector<8x32xf32>
    %313 = arith.mulf %312, %311 : vector<8x32xf32>
    %314 = arith.addf %270, %313 : vector<8x32xf32>
    %c0_146 = arith.constant 0 : index
    %c0_147 = arith.constant 0 : index
    %c0_148 = arith.constant 0 : index
    %315 = vector.load %arg19[%c0_146, %c0_147, %c0_148] : memref<1x8x32xf32, #tpu.memory_space<vmem>>, vector<1x8x32xf32>
    %316 = vector.shape_cast %315 : vector<1x8x32xf32> to vector<8x32xf32>
    %317 = vector.shape_cast %314 : vector<8x32xf32> to vector<1x8x32xf32>
    tpu.vector_store %arg19[%c0_146, %c0_147, %c0_148], %317 {strides = array<i32>} : memref<1x8x32xf32, #tpu.memory_space<vmem>>, vector<1x8x32xf32>,
    return
  }
  func.func @transform_0(%arg0: i32) -> (i32, i32, i32) {
    %c0_i32 = arith.constant 0 : i32
    %c0_i32_0 = arith.constant 0 : i32
    %c0_i32_1 = arith.constant 0 : i32
    return %arg0, %c0_i32, %c0_i32_0 : i32, i32, i32
  }
  func.func @transform_1(%arg0: i32) -> (i32, i32, i32) {
    %c0_i32 = arith.constant 0 : i32
    %c0_i32_0 = arith.constant 0 : i32
    %c0_i32_1 = arith.constant 0 : i32
    return %arg0, %c0_i32, %c0_i32_0 : i32, i32, i32
  }
  func.func @transform_2(%arg0: i32) -> (i32, i32) {
    %c0_i32 = arith.constant 0 : i32
    %c0_i32_0 = arith.constant 0 : i32
    %c0_i32_1 = arith.constant 0 : i32
    return %c0_i32, %c0_i32_0 : i32, i32
  }
  func.func @transform_3(%arg0: i32) -> (i32, i32) {
    %c0_i32 = arith.constant 0 : i32
    %c0_i32_0 = arith.constant 0 : i32
    %c0_i32_1 = arith.constant 0 : i32
    return %c0_i32, %c0_i32_0 : i32, i32
  }
  func.func @transform_4(%arg0: i32) -> (i32, i32) {
    %c0_i32 = arith.constant 0 : i32
    %c0_i32_0 = arith.constant 0 : i32
    %c0_i32_1 = arith.constant 0 : i32
    return %c0_i32, %c0_i32_0 : i32, i32
  }
  func.func @transform_5(%arg0: i32) -> (i32, i32) {
    %c0_i32 = arith.constant 0 : i32
    %c0_i32_0 = arith.constant 0 : i32
    %c0_i32_1 = arith.constant 0 : i32
    return %c0_i32, %c0_i32_0 : i32, i32
  }
  func.func @transform_6(%arg0: i32) -> (i32, i32) {
    %c0_i32 = arith.constant 0 : i32
    %c0_i32_0 = arith.constant 0 : i32
    %c0_i32_1 = arith.constant 0 : i32
    return %c0_i32, %c0_i32_0 : i32, i32
  }
  func.func @transform_7(%arg0: i32) -> (i32, i32) {
    %c0_i32 = arith.constant 0 : i32
    %c0_i32_0 = arith.constant 0 : i32
    %c0_i32_1 = arith.constant 0 : i32
    return %c0_i32, %c0_i32_0 : i32, i32
  }
  func.func @transform_8(%arg0: i32) -> (i32, i32) {
    %c0_i32 = arith.constant 0 : i32
    %c0_i32_0 = arith.constant 0 : i32
    %c0_i32_1 = arith.constant 0 : i32
    return %c0_i32, %c0_i32_0 : i32, i32
  }
  func.func @transform_9(%arg0: i32) -> (i32, i32) {
    %c0_i32 = arith.constant 0 : i32
    %c0_i32_0 = arith.constant 0 : i32
    %c0_i32_1 = arith.constant 0 : i32
    return %c0_i32, %c0_i32_0 : i32, i32
  }
  func.func @transform_10(%arg0: i32) -> (i32, i32) {
    %c0_i32 = arith.constant 0 : i32
    %c0_i32_0 = arith.constant 0 : i32
    %c0_i32_1 = arith.constant 0 : i32
    return %c0_i32, %c0_i32_0 : i32, i32
  }
  func.func @transform_11(%arg0: i32) -> (i32, i32) {
    %c0_i32 = arith.constant 0 : i32
    %c0_i32_0 = arith.constant 0 : i32
    %c0_i32_1 = arith.constant 0 : i32
    return %c0_i32, %c0_i32_0 : i32, i32
  }
  func.func @transform_12(%arg0: i32) -> (i32, i32) {
    %c0_i32 = arith.constant 0 : i32
    %c0_i32_0 = arith.constant 0 : i32
    %c0_i32_1 = arith.constant 0 : i32
    return %c0_i32, %c0_i32_0 : i32, i32
  }
  func.func @transform_13(%arg0: i32) -> (i32, i32) {
    %c0_i32 = arith.constant 0 : i32
    %c0_i32_0 = arith.constant 0 : i32
    %c0_i32_1 = arith.constant 0 : i32
    return %c0_i32, %c0_i32_0 : i32, i32
  }
  func.func @transform_14(%arg0: i32) -> (i32, i32) {
    %c0_i32 = arith.constant 0 : i32
    %c0_i32_0 = arith.constant 0 : i32
    %c0_i32_1 = arith.constant 0 : i32
    return %c0_i32, %c0_i32_0 : i32, i32
  }
  func.func @transform_15(%arg0: i32) -> (i32, i32) {
    %c0_i32 = arith.constant 0 : i32
    %c0_i32_0 = arith.constant 0 : i32
    %c0_i32_1 = arith.constant 0 : i32
    return %c0_i32, %c0_i32_0 : i32, i32
  }
  func.func @transform_16(%arg0: i32) -> (i32, i32) {
    %c0_i32 = arith.constant 0 : i32
    %c0_i32_0 = arith.constant 0 : i32
    %c0_i32_1 = arith.constant 0 : i32
    return %c0_i32, %c0_i32_0 : i32, i32
  }
  func.func @transform_17(%arg0: i32) -> (i32, i32) {
    %c0_i32 = arith.constant 0 : i32
    %c0_i32_0 = arith.constant 0 : i32
    %c0_i32_1 = arith.constant 0 : i32
    return %c0_i32, %c0_i32_0 : i32, i32
  }
  func.func @transform_18(%arg0: i32) -> (i32, i32, i32) {
    %c0_i32 = arith.constant 0 : i32
    %c0_i32_0 = arith.constant 0 : i32
    %c0_i32_1 = arith.constant 0 : i32
    return %arg0, %c0_i32, %c0_i32_0 : i32, i32, i32
  }
}

</mosaic_0001>

<bundles_post_ra>
// kernel: tpu_custom_call.1
= control target key start
LH: loop header
LB: loop body
LE: loop exit
PB: predicated region body
PF: predicated region fallthrough
CT: control target
= control target key end

     0   :  { %s3633_s0 = inlined_call_operand.hbm [shape: f32[2,8,32], index: 0, kind: input, shape index: {}]   ;;  %s3634_s1 = inlined_call_operand.vmem [shape: f32[2,6,32], index: 1, kind: input, shape index: {}]   ;;  %s3635_s2 = inlined_call_operand.vmem [shape: f32[8,4], index: 2, kind: input, shape index: {}]   ;;  %s3636_s3 = inlined_call_operand.vmem [shape: f32[8,4], index: 3, kind: input, shape index: {}]   ;;  %s3637_s4 = inlined_call_operand.hbm [shape: f32[1,32], index: 4, kind: input, shape index: {}]   ;;  %s3638_s5 = inlined_call_operand.hbm [shape: f32[1,32], index: 5, kind: input, shape index: {}]   ;;  %s3639_s6 = inlined_call_operand.hbm [shape: f32[1,32], index: 6, kind: input, shape index: {}]   ;;  %s3640_s7 = inlined_call_operand.hbm [shape: f32[1,32], index: 7, kind: input, shape index: {}]   ;;  %s3641_s8 = inlined_call_operand.vmem [shape: f32[1,32], index: 8, kind: input, shape index: {}]   ;;  %s3642_s9 = inlined_call_operand.vmem [shape: f32[1,32], index: 9, kind: input, shape index: {}]   ;;  %s3643_s10 = inlined_call_operand.vmem [shape: f32[1,32], index: 10, kind: input, shape index: {}]   ;;  %s3644_s11 = inlined_call_operand.vmem [shape: f32[1,32], index: 11, kind: input, shape index: {}]   ;;  %s3645_s12 = inlined_call_operand.vmem [shape: f32[32,32], index: 12, kind: input, shape index: {}]   ;;  %s3646_s13 = inlined_call_operand.vmem [shape: f32[32,32], index: 13, kind: input, shape index: {}]   ;;  %s3647_s14 = inlined_call_operand.vmem [shape: f32[32,32], index: 14, kind: input, shape index: {}]   ;;  %s3648_s15 = inlined_call_operand.hbm [shape: f32[32,32], index: 15, kind: input, shape index: {}]   ;;  %s3649_s16 = inlined_call_operand.vmem [shape: f32[32,192], index: 16, kind: input, shape index: {}]   ;;  %s3650_s17 = inlined_call_operand.vmem [shape: f32[96,32], index: 17, kind: input, shape index: {}]   ;;  %s3651_s18 = inlined_call_operand.hbm [shape: f32[2,8,32], index: 18, kind: output, shape index: {}]  }
   0x1   :  { %3663 = sst [smem:[#allocation27_spill]] %s3633_s0 }
   0x2   :  { %3664 = sst [smem:[#allocation28_spill]] %s3634_s1 }
   0x3   :  { %3665 = sst [smem:[#allocation29_spill]] %s3635_s2 }
   0x4   :  { %3666 = sst [smem:[#allocation30_spill]] %s3637_s4 }
   0x5   :  { %3667 = sst [smem:[#allocation31_spill]] %s3638_s5 }
   0x6   :  { %3668 = sst [smem:[#allocation32_spill]] %s3639_s6 }
   0x7   :  { %3669 = sst [smem:[#allocation33_spill]] %s3640_s7 }
   0x8   :  { %3670 = sst [smem:[#allocation34_spill]] %s3648_s15 }
   0x9   :  { %3671 = sst [smem:[#allocation35_spill]] %s3650_s17 }
   0xa   :  { %3672 = sst [smem:[#allocation36_spill]] %s3651_s18 }
   0xb   :  { %23 = vsyncpa [#allocation7], 0 }
   0xc   :  { %25 = vsyncpa [#allocation7 + $0x1], 0 }
   0xd   :  { %26 = vsyncpa [#allocation10], 0 }
   0xe   :  { %27 = vsyncpa [#allocation13], 0 }
   0xf   :  { %28 = vsyncpa [#allocation16], 0 }
  0x10   :  { %29 = vsyncpa [#allocation8], 0 }
  0x11   :  { %31 = vsyncpa [#allocation8 + $0x1], 0  ;;  %s3054_s27 = smov 0   ;;  %s3056_s28 = smov 0  }
  0x12   :  { %s3058_s29 = smov 0   ;;  %s3060_s30 = smov 0  }
  0x13 LB: > { %3673 = sst [smem:[#allocation23_spill]] %s2930_s29  ;;  %s2936_s0 = smov [#allocation9]   ;;  %s2934_s30 = sphi %s3060_s30, %s3707_s30   ;;  %s2930_s29 = sphi %s3058_s29, %s3709_s29   ;;  %s2926_s28 = sphi %s3056_s28, %s3711_s28   ;;  %s2922_s27 = sphi %s3054_s27, %s3710_s27  }
  0x14   : > { %3674 = sst [smem:[#allocation24_spill]] %s2934_s30  ;;  %s475_s19 = sshll.u32 %s2936_s0, 4  ;;  %s476_s19 = int_to_ptr.vmem [resolvable:$true] %s475_s19 }
  0x15   : > { %s3075_s1 = sadd.s32 4294967295, %s2934_s30   ;;  %p2350_p0 = scmp.ge.s32.totalorder %s2934_s30, 1 }
  0x16   : > { %p3655_p1 = scmp.eq.s32.totalorder %s3075_s1, 0  ;;  %p456_p2 = scmp.lt.s32.totalorder %s2934_s30, 3 }
  0x17   : > { %s2937_s21 = smov [#allocation12]   ;;  %s2938_s2 = smov [#allocation11]  }
  0x18   : > { %p3080_p3 = pnand %p2350_p0, %p456_p2  ;;  %s497_s22 = sshll.u32 %s2937_s21, 4  ;;  %s3087_s22 = int_to_ptr.vmem [resolvable:$true] %s497_s22 }
  0x19   : > { %s486_s23 = sshll.u32 %s2938_s2, 4  ;;  %s2939_s25 = smov [#allocation14]   ;;  %s3095_s23 = int_to_ptr.vmem [resolvable:$true] %s486_s23 }
  0x1a   : > { %s3675_s20 = scalar_select %p3080_p3, 1, 0 }
  0x1b   : > { %p2583_p5 = pneg %p3080_p3  ;;  %s3097_s26 = sshll.u32 %s2939_s25, 4  ;;  %s509_s26 = int_to_ptr.vmem [resolvable:$true] %s3097_s26 }
  0x1c   : > { %s2711_s21 = scalar_lea.vmem %s476_s19, 16  ;;  %s2718_s2 = scalar_lea.vmem %s476_s19, 32 }
  0x1d   : > { %p3091_p6 = pnand %p2583_p5, %p3655_p1  ;;  %p2712_p8 = scmp.ne.s32.totalorder %s476_s19, %s2711_s21 }
  0x1e   : > { %p2719_p11 = scmp.lt.s32.totalorder %s476_s19, %s476_s19  ;;  %p2720_p12 = scmp.lt.s32.totalorder %s2718_s2, %s2711_s21 }
  0x1f   : > { %p3101_p7 = pneg %p3091_p6 }
  0x20   : > { %p2721_p13 = por %p2720_p12, %p2719_p11 }
  0x21   : > { %p2714_p9 = pnand %p2712_p8, %p3101_p7 }
  0x23   : > { %p2715_p10 = pneg %p2714_p9 }
  0x25   : > { %p2722_p0 = pnand %p2721_p13, %p2715_p10 }
  0x27   : > { %2725 = shalt.err (!%p2722_p0)
}
  0x28   : > { %s3678_s4 = sld [smem:[#allocation30_spill]]  ;;  %s2737_s17 = scalar_lea.vmem %s3087_s22, 16 }
  0x29   : > { %p2738_p2 = scmp.ne.s32.totalorder %s3087_s22, %s2737_s17  ;;  %s2744_s21 = scalar_lea.vmem %s3087_s22, 32 }
  0x2a   : > { %p2745_p9 = scmp.lt.s32.totalorder %s3087_s22, %s3087_s22  ;;  %p2746_p10 = scmp.lt.s32.totalorder %s2744_s21, %s2737_s17 }
  0x2b   : > { %p2740_p5 = pnand %p2738_p2, %p3101_p7 }
  0x2c   : > { %p2747_p11 = por %p2746_p10, %p2745_p9 }
  0x2d   : > { %p2741_p8 = pneg %p2740_p5 }
  0x2e   : > { %2586 = dma.hbm_to_vmem [thread:$0]  (!%p3091_p6), %s3678_s4, 16, %s476_s19, [#allocation10]  }
  0x2f   : > { %p2748_p12 = pnand %p2747_p11, %p2741_p8 }
  0x31   : > { %2751 = shalt.err (!%p2748_p12)
}
  0x32   : > { %s3679_s6 = sld [smem:[#allocation32_spill]]  ;;  %s2763_s19 = scalar_lea.vmem %s3095_s23, 16 }
  0x33   : > { %p2764_p13 = scmp.ne.s32.totalorder %s3095_s23, %s2763_s19  ;;  %s2770_s17 = scalar_lea.vmem %s3095_s23, 32 }
  0x34   : > { %p2771_p5 = scmp.lt.s32.totalorder %s3095_s23, %s3095_s23  ;;  %p2772_p8 = scmp.lt.s32.totalorder %s2770_s17, %s2763_s19 }
  0x35   : > { %p2766_p0 = pnand %p2764_p13, %p3101_p7 }
  0x36   : > { %p2773_p9 = por %p2772_p8, %p2771_p5 }
  0x37   : > { %p2767_p2 = pneg %p2766_p0 }
  0x38   : > { %2592 = dma.hbm_to_vmem [thread:$0]  (!%p3091_p6), %s3679_s6, 16, %s3087_s22, [#allocation13]  }
  0x39   : > { %p2774_p10 = pnand %p2773_p9, %p2767_p2 }
  0x3b   : > { %2777 = shalt.err (!%p2774_p10)
}
  0x3c   : > { %s3680_s5 = sld [smem:[#allocation31_spill]]  ;;  %s2940_s22 = smov [#allocation15]  }
  0x3d   : > { %s539_s18 = sshll.u32 %s2940_s22, 4  ;;  %s2789_s2 = scalar_lea.vmem %s509_s26, 16  ;;  %s540_s18 = int_to_ptr.vmem [resolvable:$true] %s539_s18 }
  0x3e   : > { %p2790_p11 = scmp.ne.s32.totalorder %s509_s26, %s2789_s2  ;;  %s2796_s19 = scalar_lea.vmem %s509_s26, 32 }
  0x3f   : > { %p2797_p0 = scmp.lt.s32.totalorder %s509_s26, %s509_s26  ;;  %p2798_p2 = scmp.lt.s32.totalorder %s2796_s19, %s2789_s2 }
  0x40   : > { %p2792_p12 = pnand %p2790_p11, %p3101_p7 }
  0x41   : > { %p2799_p5 = por %p2798_p2, %p2797_p0 }
  0x42   : > { %2589 = dma.hbm_to_vmem [thread:$0]  (!%p3091_p6), %s3680_s5, 16, %s3095_s23, [#allocation10]  }
  0x43   : > { %p2793_p13 = pneg %p2792_p12 }
  0x45   : > { %p2800_p8 = pnand %p2799_p5, %p2793_p13 }
  0x47   : > { %2803 = shalt.err (!%p2800_p8)
}
  0x48   : > { %s3681_s7 = sld [smem:[#allocation33_spill]]  ;;  %s2815_s23 = scalar_lea.vmem %s540_s18, 512 }
  0x49   : > { %p2816_p9 = scmp.ne.s32.totalorder %s540_s18, %s2815_s23  ;;  %p2823_p12 = scmp.lt.s32.totalorder %s540_s18, %s540_s18 }
  0x4a   : > { %p2824_p4 = scmp.lt.s32.totalorder %s2815_s23, %s2815_s23 }
  0x4b   : > { %p2818_p10 = pnand %p2816_p9, %p3101_p7 }
  0x4c   : > { %p2825_p1 = por %p2824_p4, %p2823_p12 }
  0x4d   : > { %p2819_p11 = pneg %p2818_p10 }
  0x4e   : > { %2595 = dma.hbm_to_vmem [thread:$0]  (!%p3091_p6), %s3681_s7, 16, %s509_s26, [#allocation13]  }
  0x4f   : > { %p2826_p3 = pnand %p2825_p1, %p2819_p11 }
  0x51   : > { %2829 = shalt.err (!%p2826_p3)
}
  0x52   : > { %s2941_s21 = smov 128   ;;  %s2942_s26 = smov 8  }
  0x53   : > { %s3682_s15 = sld [smem:[#allocation34_spill]]  ;;  %s2349_s2 = sadd.s32 4294967294, %s2934_s30  }
  0x54   : > { %s3155_s19 = sadd.s32 1, %s2934_s30   ;;  %s44_s17 = sadd.s32 1, %s2930_s29 }
  0x55   : > { %3683 = sst [smem:[#allocation25_spill]] %s3155_s19  ;;  %s41_s25 = ssub.s32 %s2934_s30, %s3155_s19 }
  0x56   : > { %p51_p1 = scmp.ne.s32.totalorder %s2930_s29, %s2926_s28  ;;  %p42_p3 = scmp.eq.s32.totalorder %s41_s25, 0 }
  0x57   : > { %p52_p4 = scmp.eq.s32.totalorder %s2934_s30, 0  ;;  %p57_p7 = scmp.ne.s32.totalorder %s2926_s28, %s2922_s27 }
  0x58   : > { %p443_p13 = scmp.eq.s32.totalorder %s3075_s1, 1  ;;  %p3685_p2 = scmp.eq.s32.totalorder %s3075_s1, 0 }
  0x59   : > { %2598 = dma.hbm_to_vmem [thread:$0]  (!%p3091_p6), %s3682_s15, 512, %s540_s18, [#allocation16], %s2941_s21, %s2941_s21, %s2942_s26  }
  0x5a   : > { %s3167_s23 = scalar_select %p42_p3, %s2930_s29, %s44_s17  }
  0x5b   : > { %p53_p0 = por %p52_p4, %p51_p1  ;;  %p3171_p5 = por %p3685_p2, %p57_p7 }
  0x5c   : > { %3684 = sst [smem:[#allocation26_spill]] %s3167_s23  ;;  %p3175_p6 = por %p443_p13, %p51_p1 }
  0x5d   : > { %s3686_s24 = scalar_select %p3171_p5, 1, 0 }
  0x5e   : > { %s3687_s18 = scalar_select %p3175_p6, 1, 0 }
  0x5f   : > { %p449_p8 = scmp.eq.s32.totalorder %s2349_s2, 1  ;;  %p2612_p9 = scmp.lt.s32.totalorder %s2934_s30, 2 }
  0x60   : > { %s559_s21 = sand.u32 1, %s2930_s29   ;;  %s2358_s22 = sshll.u32 %s2934_s30, 7 }
  0x61   : > { %p3181_p10 = por %p449_p8, %p57_p7  ;;  %s2357_s0 = sshll.u32 %s559_s21, 3 }
  0x62   : > { %s3689_s4 = sld [smem:[#allocation27_spill]]  ;;  %s563_s6 = scalar_lea.vmem [#allocation6], %s2357_s0 }
  0x63   : > { %s3688_s26 = scalar_select %p3181_p10, 1, 0 }
  0x64   : > { %s570_s7 = sshll.u32 %s563_s6, 4  ;;  %p3191_p11 = pnand %p2612_p9, %p53_p0  ;;  %s571_s7 = int_to_ptr.vmem [resolvable:$true] %s570_s7 }
  0x65   : > { %s560_s15 = scalar_lea.sflag [#allocation7], %s559_s21 }
  0x66   : > { %p2832_p1 = pneg %p3191_p11 }
  0x68   : > { %s3189_s5 = scalar_lea.hbm %s3689_s4, %s2358_s22  ;;  %s2835_s25 = scalar_lea.hbm %s3689_s4, 256 }
  0x69   : > { %s2830_s23 = scalar_lea.hbm %s3189_s5, 128  ;;  %p2836_p7 = scmp.lt.s32.totalorder %s3189_s5, %s3689_s4 }
  0x6a   : > { %p2831_p12 = scmp.ne.s32.totalorder %s3189_s5, %s2830_s23  ;;  %p2837_p13 = scmp.lt.s32.totalorder %s2835_s25, %s2830_s23 }
  0x6c   : > { %p2833_p3 = pnand %p2832_p1, %p2831_p12  ;;  %p2838_p0 = por %p2837_p13, %p2836_p7 }
  0x6e   : > { %p2834_p4 = pneg %p2833_p3 }
  0x70   : > { %p2839_p2 = pnand %p2838_p0, %p2834_p4 }
  0x72   : > { %2842 = shalt.err (!%p2839_p2)
}
  0x73   : > { %s2843_s6 = scalar_lea.vmem %s571_s7, 128  ;;  %s2943_s21 = smov [#allocation6]  }
  0x74   : > { %p2844_p8 = scmp.ne.s32.totalorder %s571_s7, %s2843_s6  ;;  %s2848_s19 = sshll.u32 %s2943_s21, 4  ;;  %s2849_s19 = int_to_ptr.vmem [resolvable:$false] %s2848_s19 }
  0x75   : > { %s2850_s30 = scalar_lea.vmem %s2849_s19, 256  ;;  %p2851_p12 = scmp.lt.s32.totalorder %s571_s7, %s2849_s19 }
  0x76   : > { %p2846_p9 = pnand %p2844_p8, %p2832_p1  ;;  %p2852_p3 = scmp.lt.s32.totalorder %s2850_s30, %s2843_s6 }
  0x78   : > { %p2847_p10 = pneg %p2846_p9  ;;  %p2853_p6 = por %p2852_p3, %p2851_p12 }
  0x7a   : > { %p2854_p5 = pnand %p2853_p6, %p2847_p10 }
  0x7c   : > { %2857 = shalt.err (!%p2854_p5)
}
  0x7d   : > { %2602 = dma.hbm_to_vmem [thread:$0]  (!%p3191_p11), %s3189_s5, 128, %s571_s7, %s560_s15  }
  0x7e   : > { %p3691_p4 = scmp.ne.s32.totalorder %s3675_s20, 0 }
  0x7f   : > { %s3212_s29 = sand.u32 (!%p3691_p4), 1, %s2926_s28   ;;  %p3692_p6 = scmp.ne.s32.totalorder (!%p3691_p4), %s3686_s24, 0 }
  0x80   : > { %586 = sbr.rel (%p3691_p4) target bundleno = 3498 (0xdaa), region = 92  ;;  %s2360_s23 = sshll.u32 (!%p3691_p4), %s3212_s29, 3 }
  0x81   : > { %s589_s19 = scalar_lea.sflag (!%p3691_p4), [#allocation7], %s3212_s29  ;;  %s592_s30 = scalar_lea.vmem (!%p3691_p4), [#allocation6], %s2360_s23 }
  0x85   : > { %2901 = dma.done.wait (%p3692_p6), %s589_s19, 128  }
  0x86   : > { %2903 = vsyncadd (%p3692_p6), %s589_s19, 4294967168  ;;  %p3693_p5 = scmp.eq.s32.totalorder %s3075_s1, 0 }
  0x88   : > { %2905 = dma.done.wait (%p3693_p5), [#allocation10], 32   ;;  %p3694_p10 = pmov %p3693_p5 }
  0x89   : > { %p3695_p11 = pmov %p3693_p5 }
  0x8a   : > { %2907 = vsyncadd (%p3694_p10), [#allocation10], 4294967264 }
  0x8b   : > { %2909 = dma.done.wait (%p3695_p11), [#allocation13], 32   ;;  %p3696_p1 = pmov %p3693_p5 }
  0x8d   : > { %2911 = vsyncadd (%p3696_p1), [#allocation13], 4294967264  ;;  %p3697_p7 = pmov %p3696_p1 }
  0x8e   : > { %p3698_p13 = pmov %p3696_p1 }
  0x8f   : > { %2913 = dma.done.wait (%p3697_p7), [#allocation16], 512  }
  0x90   : > { %2915 = vsyncadd (%p3698_p13), [#allocation16], 4294966784  ;;  %vm677_vm0 = vcmask 261120   ;;  %v3234_v0 = vld [vmem:[%s592_s30] sm:$0xff]  ;;  %v720_v7 = vld [vmem:[%s3645_s12 + $0x18] sm:$0xff]  ;;  %v2944_v9 = vmov 0.0   ;;  %v707_v19 = vlaneseq }
  0x91   : > { %v678_v1 = vsel %vm677_vm0, %v3234_v0, 0.0  ;;  %v871_v8 = vld [vmem:[%s3647_s14 + $0x18] sm:$0xff]  ;;  %2448 = vmatprep.subr.mxu1 %v2944_v9  ;;  %2470 = vmatprep.subr.mxu0 %v2944_v9  ;;  %v719_v10 = vld [vmem:[%s3645_s12 + $0x10] sm:$0xff]  ;;  %v718_v12 = vld [vmem:[%s3645_s12 + $0x8] sm:$0xff]  ;;  %vm2945_vm1 = vmmov 0   ;;  %p669_p0 = scmp.lt.s32.totalorder %s3075_s1, 1 }
  0x92   : > { %679 = vadd.xlane.f32.xlu0 %v678_v1  ;;  %v870_v11 = vld [vmem:[%s3647_s14 + $0x10] sm:$0xff]  ;;  %2449 = vmatpush3.msra.mxu1 %v720_v7  ;;  %v869_v13 = vld [vmem:[%s3647_s14 + $0x8] sm:$0xff]  ;;  %v717_v14 = vld [vmem:[%s3645_s12] sm:$0xff]  ;;  %s3699_s22 = sld [smem:[#allocation28_spill]]  ;;  %v3283_v20 = vshrl.u32 %v707_v19, 7  ;;  %s2946_s2 = smov 12  }
  0x93   : > { %2471 = vmatpush3.msra.mxu0 %v871_v8  ;;  %2450 = vmatprep.subr.mxu1 %v2944_v9  ;;  %v868_v15 = vld [vmem:[%s3647_s14] sm:$0xff]  ;;  %s670_s15 = scalar_select %p669_p0, %s3075_s1, 1  ;;  %v2368_v25 = vld [vmem:[#allocation9] ss:$0 sm:$0xff]  ;;  %v2369_v28 = vld [vmem:[#allocation11] ss:$0 sm:$0xff] }
  0x94   : > { %2472 = vmatprep.subr.mxu0 %v2944_v9  ;;  %2451 = vmatpush3.msra.mxu1 %v719_v10  ;;  %v709_v23 = vsub.s32 1, %v3283_v20  ;;  %v714_v27 = vsub.s32 0, %v3283_v20  ;;  %v797_v35 = vld [vmem:[%s3646_s13 + $0x18] sm:$0xff]  ;;  %v796_v36 = vld [vmem:[%s3646_s13 + $0x10] sm:$0xff]  ;;  %v795_v37 = vld [vmem:[%s3646_s13 + $0x8] sm:$0xff]  ;;  %s3700_s24 = sld [smem:[#allocation29_spill]] }
  0x95   : > { %2473 = vmatpush3.msra.mxu0 %v870_v11  ;;  %2452 = vmatprep.subr.mxu1 %v2944_v9  ;;  %s2367_s20 = sshll.u32 %s670_s15, 3  ;;  %v794_v38 = vld [vmem:[%s3646_s13] sm:$0xff]  ;;  %s2949_s25 = smov 16   ;;  %vm1015_vm2 = vcmask 31744   ;;  %vm1029_vm3 = vcmask 64544   ;;  %vm1061_vm4 = vcmask 97344  }
  0x96   : > { %2474 = vmatprep.subr.mxu0 %v2944_v9  ;;  %2453 = vmatpush3.msra.mxu1 %v718_v12  ;;  %s2950_s0 = smov 20   ;;  %s2951_s6 = smov 24   ;;  %v3342_v58 = vld [vmem:[%s3636_s3] sm:$0xff]  ;;  %vm1077_vm5 = vcmask 130144   ;;  %vm1109_vm6 = vcmask 162944   ;;  %vm1125_vm7 = vcmask 195744  }
  0x97   : > { %2475 = vmatpush3.msra.mxu0 %v869_v13  ;;  %2454 = vmatprep.subr.mxu1 %v2944_v9  ;;  %s2952_s30 = smov 28   ;;  %s2953_s15 = smov 124   ;;  %vm1157_vm8 = vcmask 228544   ;;  %vm1173_vm9 = vcmask 261344   ;;  %vm1193_vm10 = vcmask 64512   ;;  %vm1533_vm11 = vcmask 130112  }
  0x98   : > { %2476 = vmatprep.subr.mxu0 %v2944_v9  ;;  %2455 = vmatpush3.msra.mxu1 %v717_v14  ;;  %s672_s17 = scalar_lea.vmem %s3699_s22, %s2367_s20  ;;  %s2947_s22 = smov 4   ;;  %vm1711_vm12 = vcmask 195712   ;;  %vm1889_vm13 = vcmask 261312   ;;  %vm2124_vm14 = vcmask 785408  }
  0x99   : > { %2456 = vmatprep.mubr.msk.f32.mxu1 %vm2945_vm1, %v2944_v9  ;;  %2459 = vmatprep.subr.mxu1 %v2944_v9  ;;  %v3285_v21 = vld [vmem:[%s672_s17] sm:$0x3f]  ;;  %s2948_s17 = smov 8   ;;  %s2957_s19 = smov 32  }
  0x9a   : > { %2477 = vmatpush3.msra.mxu0 %v868_v15  ;;  %2478 = vmatprep.mubr.msk.f32.mxu0 %vm2945_vm1, %v2944_v9  ;;  %v3288_v22 = vadd.f32 1.0, %v3285_v21  ;;  %v715_v32 = vrot.slane %v3285_v21, %v714_v27  ;;  %v3327_v57 = vld [vmem:[%s3700_s24] sm:$0xff]  ;;  %s668_s5 = scalar_lea.vmem [#allocation17], %s2360_s23  ;;  %p3703_p8 = scmp.ne.s32.totalorder %s3687_s18, 0 }
  0x9b   : > { %2501 = vmatprep.subr.mxu0 %v2944_v9  ;;  %s2219_s7 = sshll.u32 %s668_s5, 4  ;;  %s2220_s7 = int_to_ptr.vmem [resolvable:$true] %s2219_s7 }
  0x9c   : > { %v710_v30 = vrot.slane %v3288_v22, %v709_v23  ;;  %v2376_v23 = vld [vmem:[%s3642_s9] ss:$0 sm:$0xff] }
 0x11b   : > { %v680_v2 = vpop.xlane.xlu0 %679 }
 0x11c   : > { %v682_v3 = vmul.f32 0.03125, %v680_v2 }
 0x11e   : > { %v683_v4 = vsub.f32 %v3234_v0, %v682_v3  ;;  %v2373_v3 = vld [vmem:[#allocation12] ss:$0 sm:$0xff] }
 0x120   : > { %v684_v5 = vmul.f32 %v683_v4, %v683_v4 }
 0x122   : > { %v685_v6 = vsel %vm677_vm0, %v684_v5, 0.0  ;;  %v2374_v5 = vld [vmem:[#allocation14] ss:$0 sm:$0xff] }
 0x123   : > { %686 = vadd.xlane.f32.xlu0 %v685_v6 }
 0x1ac   : > { %v687_v16 = vpop.xlane.xlu0 %686 }
 0x1ad   : > { %v688_v17 = vmul.f32 0.03125, %v687_v16  ;;  %v2375_v16 = vld [vmem:[%s3641_s8] ss:$0 sm:$0xff] }
 0x1af   : > { %v689_v18 = vadd.f32 1e-05, %v688_v17 }
 0x1b1   : > { %2672 = vrsqrt.f32 %v689_v18 }
 0x1be   : > { %v2673_v24 = vpop.eup %2672 }
 0x1bf   : > { %v691_v26 = vmul.f32 %v2673_v24, %v683_v4 }
 0x1c1   : > { %v698_v29 = vmul.f32 %v2368_v25, %v691_v26 }
 0x1c3   : > { %v705_v31 = vadd.f32 %v2369_v28, %v698_v29 }
 0x1c5   : > { %v711_v33 = vmul.f32 %v710_v30, %v705_v31 }
 0x1c7   : > { %v716_v34 = vadd.f32 %v715_v32, %v711_v33 }
 0x1c9   : > { %2457 = vmatmul.mubr.msk.f32.vlgmr.msra.gmra.mxu1 %vm677_vm0, %v716_v34  ;;  %2479 = vmatmul.mubr.msk.f32.vlgmr.msra.gmra.mxu0 %vm677_vm0, %v716_v34 }
 0x1ca   : > { %2460 = vmatpush3.msra.mxu1 %v797_v35  ;;  %2467 = vmatprep.mubr.msk.f32.mxu1 %vm2945_vm1, %v2944_v9 }
 0x1cb   : > { %2461 = vmatprep.subr.mxu1 %v2944_v9  ;;  %2503 = vmatprep.mubr.msk.f32.mxu0 %vm2945_vm1, %v2944_v9 }
 0x1cc   : > { %2462 = vmatpush3.msra.mxu1 %v796_v36 }
 0x1cd   : > { %2463 = vmatprep.subr.mxu1 %v2944_v9 }
 0x1ce   : > { %2464 = vmatpush3.msra.mxu1 %v795_v37 }
 0x1cf   : > { %2465 = vmatprep.subr.mxu1 %v2944_v9 }
 0x1d0   : > { %2466 = vmatpush3.msra.mxu1 %v794_v38 }
 0x1d1   : > { %2468 = vmatmul.mubr.msk.f32.vlgmr.msra.gmra.mxu1 %vm677_vm0, %v716_v34  ;;  %2481 = vmatprep.subr.mxu1 %v2944_v9 }
 0x1d2   : > { %2483 = vmatprep.mubr.msk.f32.mxu1 %vm2945_vm1, %v2944_v9 }
 0x289   : > { %v790_v39 = vpop.f32.mrf.mxu1  ;;  %v938_v40 = vpop.f32.mrf.mxu0 }
 0x28a   : > { %1000 = vst.msk [vmem:[#allocation4] sm:$0xff] %vm677_vm0, %v938_v40  ;;  %v944_v46 = vsel %vm677_vm0, %v790_v39, 0.0 }
 0x28b   : > { %v2458_v41 = vpop.f32.mrf.mxu1  ;;  %v2480_v42 = vpop.f32.mrf.mxu0 }
 0x291   : > { %v864_v43 = vpop.f32.mrf.mxu1 }
 0x292   : > { %v973_v44 = vsel %vm677_vm0, %v864_v43, 0.0 }
 0x293   : > { %974 = vadd.xlane.f32.xlu1 %v973_v44  ;;  %v2469_v45 = vpop.f32.mrf.mxu1 }
 0x297   : > { %945 = vadd.xlane.f32.xlu1 %v944_v46 }
 0x31c   : > { %v975_v47 = vpop.xlane.xlu1 %974 }
 0x31d   : > { %v976_v48 = vmul.f32 0.03125, %v975_v47 }
 0x31f   : > { %v977_v49 = vsub.f32 %v864_v43, %v976_v48 }
 0x320   : > { %v946_v50 = vpop.xlane.xlu1 %945 }
 0x321   : > { %v947_v51 = vmul.f32 0.03125, %v946_v50  ;;  %v978_v52 = vmul.f32 %v977_v49, %v977_v49 }
 0x323   : > { %v948_v53 = vsub.f32 %v790_v39, %v947_v51  ;;  %v979_v54 = vsel %vm677_vm0, %v978_v52, 0.0 }
 0x324   : > { %980 = vadd.xlane.f32.xlu0 %v979_v54 }
 0x325   : > { %v949_v55 = vmul.f32 %v948_v53, %v948_v53 }
 0x327   : > { %v950_v56 = vsel %vm677_vm0, %v949_v55, 0.0 }
 0x328   : > { %951 = vadd.xlane.f32.xlu1 %v950_v56 }
 0x339   : > { %1051 = vrot.lane.b32.xlu1 %v3327_v57, %s2946_s2 }
 0x33a   : > { %1005 = vrot.lane.b32.xlu0 %v3327_v57, %s2947_s22 }
 0x33d   : > { %1067 = vrot.lane.b32.xlu1 %v3327_v57, %s2948_s17 }
 0x33e   : > { %1115 = vrot.lane.b32.xlu0 %v3327_v57, %s2949_s25 }
 0x341   : > { %1099 = vrot.lane.b32.xlu1 %v3327_v57, %s2950_s0 }
 0x342   : > { %1163 = vrot.lane.b32.xlu0 %v3327_v57, %s2951_s6 }
 0x345   : > { %1147 = vrot.lane.b32.xlu1 %v3327_v57, %s2952_s30 }
 0x346   : > { %1063 = vrot.lane.b32.xlu0 %v3342_v58, %s2946_s2  ;;  %s2954_s2 = smov 120  }
 0x349   : > { %1018 = vrot.lane.b32.xlu1 %v3342_v58, %s2947_s22 }
 0x34a   : > { %1111 = vrot.lane.b32.xlu0 %v3342_v58, %s2950_s0  ;;  %s2956_s0 = smov 104  }
 0x34d   : > { %1047 = vrot.lane.b32.xlu1 %v3342_v58, %s2948_s17 }
 0x34e   : > { %1159 = vrot.lane.b32.xlu0 %v3342_v58, %s2952_s30  ;;  %s2396_s30 = sshll.u32 %s3075_s1, 7  ;;  %s2958_s1 = smov [#allocation17]  }
 0x34f   : > { %s2862_s23 = sshll.u32 %s2958_s1, 4  ;;  %s2863_s23 = int_to_ptr.vmem [resolvable:$false] %s2862_s23 }
 0x350   : > { %p2865_p3 = scmp.lt.s32.totalorder %s2220_s7, %s2863_s23 }
 0x351   : > { %1095 = vrot.lane.b32.xlu1 %v3342_v58, %s2949_s25 }
 0x355   : > { %1143 = vrot.lane.b32.xlu1 %v3342_v58, %s2951_s6 }
 0x3ad   : > { %v981_v60 = vpop.xlane.xlu0 %980 }
 0x3ae   : > { %v982_v63 = vmul.f32 0.03125, %v981_v60 }
 0x3b0   : > { %v983_v1 = vadd.f32 1e-05, %v982_v63 }
 0x3b1   : > { %v952_v59 = vpop.xlane.xlu1 %951  ;;  %v1006_v11 = vpop.permute.xlu0 %1005 }
 0x3b2   : > { %v953_v61 = vmul.f32 0.03125, %v952_v59 }
 0x3b4   : > { %v954_v62 = vadd.f32 1e-05, %v953_v61 }
 0x3b5   : > { %v1052_v7 = vpop.permute.xlu1 %1051  ;;  %v1116_v25 = vpop.permute.xlu0 %1115 }
 0x3b6   : > { %2674 = vrsqrt.f32 %v954_v62 }
 0x3b7   : > { %2676 = vrsqrt.f32 %v983_v1 }
 0x3b9   : > { %v1068_v12 = vpop.permute.xlu1 %1067  ;;  %v1164_v38 = vpop.permute.xlu0 %1163 }
 0x3bd   : > { %v1100_v24 = vpop.permute.xlu1 %1099  ;;  %v1064_v42 = vpop.permute.xlu0 %1063 }
 0x3c1   : > { %v1148_v29 = vpop.permute.xlu1 %1147  ;;  %v3392_v44 = vpop.permute.xlu0 %1111 }
 0x3c3   : > { %v2675_v2 = vpop.eup %2674 }
 0x3c4   : > { %v956_v4 = vmul.f32 %v2675_v2, %v948_v53  ;;  %v2677_v10 = vpop.eup %2676 }
 0x3c5   : > { %v985_v13 = vmul.f32 %v2677_v10, %v977_v49  ;;  %v1019_v41 = vpop.permute.xlu1 %1018  ;;  %v3394_v46 = vpop.permute.xlu0 %1159 }
 0x3c6   : > { %v963_v6 = vmul.f32 %v2373_v3, %v956_v4 }
 0x3c7   : > { %v992_v17 = vmul.f32 %v2375_v16, %v985_v13 }
 0x3c8   : > { %v3356_v8 = vadd.f32 %v2374_v5, %v963_v6 }
 0x3c9   : > { %v3371_v26 = vadd.f32 %v2376_v23, %v992_v17  ;;  %v1048_v43 = vpop.permute.xlu1 %1047 }
 0x3ca   : > { %v1022_v14 = vmul.f32 %v3327_v57, %v3356_v8  ;;  %v1008_v15 = vmul.f32 %v1006_v11, %v3356_v8  ;;  %v1054_v18 = vmul.f32 %v1052_v7, %v3356_v8  ;;  %v1070_v19 = vmul.f32 %v1068_v12, %v3356_v8 }
 0x3cb   : > { %v1118_v27 = vmul.f32 %v1116_v25, %v3356_v8  ;;  %v1102_v28 = vmul.f32 %v1100_v24, %v3356_v8  ;;  %v1032_v30 = vmul.f32 %v1006_v11, %v3371_v26  ;;  %v1150_v31 = vmul.f32 %v1148_v29, %v3356_v8 }
 0x3cc   : > { %1024 = vrot.lane.b32.xlu1 %v1022_v14, %s2947_s22  ;;  %1010 = vrot.lane.b32.xlu0 %v1008_v15, %s2953_s15  ;;  %v1080_v32 = vmul.f32 %v1052_v7, %v3371_v26  ;;  %v1040_v33 = vmul.f32 %v3327_v57, %v3371_v26  ;;  %v1088_v34 = vmul.f32 %v1068_v12, %v3371_v26 }
 0x3cd   : > { %v1128_v35 = vmul.f32 %v1100_v24, %v3371_v26  ;;  %v1136_v36 = vmul.f32 %v1116_v25, %v3371_v26  ;;  %v1176_v37 = vmul.f32 %v1148_v29, %v3371_v26  ;;  %v1166_v39 = vmul.f32 %v1164_v38, %v3356_v8  ;;  %v1096_v45 = vpop.permute.xlu1 %1095 }
 0x3ce   : > { %v1184_v40 = vmul.f32 %v1164_v38, %v3371_v26  ;;  %v1021_v48 = vmul.f32 %v1019_v41, %v3356_v8  ;;  %v1003_v49 = vmul.f32 %v3342_v58, %v3356_v8  ;;  %v1066_v54 = vmul.f32 %v1064_v42, %v3356_v8 }
 0x3cf   : > { %v1050_v55 = vmul.f32 %v1048_v43, %v3356_v8  ;;  %v1114_v63 = vmul.f32 %v3392_v44, %v3356_v8  ;;  %v1098_v1 = vmul.f32 %v1096_v45, %v3356_v8  ;;  %v1031_v13 = vmul.f32 %v3342_v58, %v3371_v26 }
 0x3d0   : > { %1056 = vrot.lane.b32.xlu0 %v1054_v18, %s2953_s15  ;;  %1072 = vrot.lane.b32.xlu1 %v1070_v19, %s2947_s22  ;;  %v1039_v18 = vmul.f32 %v1019_v41, %v3371_v26  ;;  %v1079_v19 = vmul.f32 %v1048_v43, %v3371_v26  ;;  %v1127_v29 = vmul.f32 %v1096_v45, %v3371_v26 }
 0x3d1   : > { %v1144_v47 = vpop.permute.xlu1 %1143  ;;  %v1183_v41 = vmul.f32 %v3394_v46, %v3371_v26 }
 0x3d2   : > { %v1146_v10 = vmul.f32 %v1144_v47, %v3356_v8 }
 0x3d4   : > { %1120 = vrot.lane.b32.xlu1 %v1118_v27, %s2947_s22  ;;  %1104 = vrot.lane.b32.xlu0 %v1102_v28, %s2953_s15  ;;  %v1087_v28 = vmul.f32 %v1064_v42, %v3371_v26 }
 0x3d8   : > { %1034 = vrot.lane.b32.xlu0 %v1032_v30, %s2953_s15  ;;  %1152 = vrot.lane.b32.xlu1 %v1150_v31, %s2953_s15 }
 0x3dc   : > { %1082 = vrot.lane.b32.xlu0 %v1080_v32, %s2953_s15  ;;  %1042 = vrot.lane.b32.xlu1 %v1040_v33, %s2947_s22 }
 0x3e0   : > { %1130 = vrot.lane.b32.xlu0 %v1128_v35, %s2953_s15  ;;  %1090 = vrot.lane.b32.xlu1 %v1088_v34, %s2947_s22  ;;  %v1135_v34 = vmul.f32 %v3392_v44, %v3371_v26  ;;  %v1175_v35 = vmul.f32 %v1144_v47, %v3371_v26  ;;  %v3436_v26 = vld [vmem:[#allocation4] sm:$0xff] }
 0x3e4   : > { %1178 = vrot.lane.b32.xlu0 %v1176_v37, %s2953_s15  ;;  %1138 = vrot.lane.b32.xlu1 %v1136_v36, %s2947_s22  ;;  %s3701_s15 = sld [smem:[#allocation35_spill]] }
 0x3e8   : > { %1186 = vrot.lane.b32.xlu0 %v1184_v40, %s2947_s22  ;;  %1168 = vrot.lane.b32.xlu1 %v1166_v39, %s2947_s22  ;;  %v1162_v40 = vmul.f32 %v3394_v46, %v3356_v8  ;;  %s2955_s22 = smov 112  }
 0x43e   : > { %v1011_v50 = vpop.permute.xlu0 %1010  ;;  %v1025_v51 = vpop.permute.xlu1 %1024 }
 0x43f   : > { %v1013_v52 = vsub.f32 %v1003_v49, %v1011_v50  ;;  %v1027_v53 = vadd.f32 %v1025_v51, %v1021_v48 }
 0x441   : > { %v1014_v56 = vmul.f32 0.35355338, %v1013_v52  ;;  %v1028_v57 = vmul.f32 0.35355338, %v1027_v53 }
 0x442   : > { %v1057_v59 = vpop.permute.xlu0 %1056  ;;  %v1073_v60 = vpop.permute.xlu1 %1072 }
 0x443   : > { %1016 = vst.msk [vmem:[#allocation2] sm:$0xff] %vm1015_vm2, %v1014_v56  ;;  %v1059_v61 = vsub.f32 %v1050_v55, %v1057_v59  ;;  %v1075_v62 = vadd.f32 %v1073_v60, %v1066_v54 }
 0x444   : > { %1030 = vst.msk [vmem:[#allocation2] sm:$0xff] %vm1029_vm3, %v1028_v57 }
 0x445   : > { %v1060_v2 = vmul.f32 0.35355338, %v1059_v61  ;;  %v1076_v3 = vmul.f32 0.35355338, %v1075_v62 }
 0x446   : > { %v1105_v4 = vpop.permute.xlu0 %1104  ;;  %v1121_v5 = vpop.permute.xlu1 %1120 }
 0x447   : > { %1062 = vst.msk [vmem:[#allocation2] sm:$0xff] %vm1061_vm4, %v1060_v2  ;;  %v1107_v6 = vsub.f32 %v1098_v1, %v1105_v4  ;;  %v1123_v7 = vadd.f32 %v1121_v5, %v1114_v63 }
 0x448   : > { %1078 = vst.msk [vmem:[#allocation2] sm:$0xff] %vm1077_vm5, %v1076_v3 }
 0x449   : > { %v1108_v11 = vmul.f32 0.35355338, %v1107_v6  ;;  %v1124_v12 = vmul.f32 0.35355338, %v1123_v7 }
 0x44a   : > { %v1035_v14 = vpop.permute.xlu0 %1034  ;;  %v1153_v15 = vpop.permute.xlu1 %1152 }
 0x44b   : > { %1110 = vst.msk [vmem:[#allocation2] sm:$0xff] %vm1109_vm6, %v1108_v11  ;;  %v1037_v16 = vsub.f32 %v1031_v13, %v1035_v14  ;;  %v1155_v17 = vsub.f32 %v1146_v10, %v1153_v15 }
 0x44c   : > { %1126 = vst.msk [vmem:[#allocation2] sm:$0xff] %vm1125_vm7, %v1124_v12 }
 0x44d   : > { %1038 = vst.msk [vmem:[#allocation3] sm:$0xff] %vm1015_vm2, %v1037_v16  ;;  %v1156_v23 = vmul.f32 0.35355338, %v1155_v17 }
 0x44e   : > { %v1083_v24 = vpop.permute.xlu0 %1082  ;;  %v1043_v25 = vpop.permute.xlu1 %1042 }
 0x44f   : > { %1158 = vst.msk [vmem:[#allocation2] sm:$0xff] %vm1157_vm8, %v1156_v23  ;;  %v1085_v58 = vsub.f32 %v1079_v19, %v1083_v24  ;;  %v1045_v27 = vadd.f32 %v1043_v25, %v1039_v18 }
 0x451   : > { %1046 = vst.msk [vmem:[#allocation3] sm:$0xff] %vm1029_vm3, %v1045_v27 }
 0x452   : > { %1086 = vst.msk [vmem:[#allocation3] sm:$0xff] %vm1061_vm4, %v1085_v58  ;;  %v1131_v30 = vpop.permute.xlu0 %1130  ;;  %v1091_v31 = vpop.permute.xlu1 %1090 }
 0x453   : > { %v1133_v32 = vsub.f32 %v1127_v29, %v1131_v30  ;;  %v1093_v33 = vadd.f32 %v1091_v31, %v1087_v28 }
 0x455   : > { %1094 = vst.msk [vmem:[#allocation3] sm:$0xff] %vm1077_vm5, %v1093_v33 }
 0x456   : > { %1134 = vst.msk [vmem:[#allocation3] sm:$0xff] %vm1109_vm6, %v1133_v32  ;;  %v1179_v36 = vpop.permute.xlu0 %1178  ;;  %v1139_v37 = vpop.permute.xlu1 %1138 }
 0x457   : > { %v1181_v38 = vsub.f32 %v1175_v35, %v1179_v36  ;;  %v1141_v39 = vadd.f32 %v1139_v37, %v1135_v34 }
 0x459   : > { %1142 = vst.msk [vmem:[#allocation3] sm:$0xff] %vm1125_vm7, %v1141_v39 }
 0x45a   : > { %1182 = vst.msk [vmem:[#allocation3] sm:$0xff] %vm1157_vm8, %v1181_v38  ;;  %v1187_v42 = vpop.permute.xlu0 %1186  ;;  %v1169_v43 = vpop.permute.xlu1 %1168 }
 0x45b   : > { %v1189_v44 = vadd.f32 %v1187_v42, %v1183_v41  ;;  %v1171_v45 = vadd.f32 %v1169_v43, %v1162_v40 }
 0x45d   : > { %1190 = vst.msk [vmem:[#allocation3] sm:$0xff] %vm1173_vm9, %v1189_v44  ;;  %v1172_v47 = vmul.f32 0.35355338, %v1171_v45 }
 0x45f   : > { %1174 = vst.msk [vmem:[#allocation2] sm:$0xff] %vm1173_vm9, %v1172_v47  ;;  %v1895_v47 = vld [vmem:[#allocation15 + $0x18] sm:$0xff] }
 0x464   : > { %v1192_v48 = vld [vmem:[#allocation3] sm:$0xff] }
 0x465   : > { %2482 = vmatpush3.xpose.msk.msra.mxu1 %vm1193_vm10, %v1192_v48 }
 0x466   : > { %v1357_v8 = vld [vmem:[#allocation2] sm:$0xff]  ;;  %2486 = vmatprep.subr.mxu1 %v2944_v9 }
 0x467   : > { %1360 = vrot.lane.b32.xlu1 %v1357_v8, %s2954_s2 }
 0x468   : > { %2484 = vmatmul.mubr.msk.f32.vlgmr.msra.gmra.mxu1 %vm1193_vm10, %v1357_v8 }
 0x469   : > { %2487 = vmatpush3.msra.mxu1 %v3436_v26  ;;  %2488 = vmatprep.mubr.msk.f32.mxu1 %vm2945_vm1, %v2944_v9 }
 0x46a   : > { %2491 = vmatprep.subr.mxu1 %v2944_v9 }
 0x4d9   : > { %v1361_v59 = vpop.permute.xlu1 %1360 }
 0x528   : > { %v1266_v46 = vpop.f32.mrf.mxu1 }
 0x529   : > { %v1270_v49 = vsel %vm1193_vm10, %v1266_v46, -inf }
 0x52a   : > { %1271 = vmax.xlane.f32.xlu0 %v1270_v49  ;;  %v2485_v50 = vpop.f32.mrf.mxu1 }
 0x540   : > { %1363 = vrot.lane.b32.xlu0 %v1192_v48, %s2954_s2 }
 0x544   : > { %1541 = vrot.lane.b32.xlu0 %v1192_v48, %s2955_s22 }
 0x548   : > { %1719 = vrot.lane.b32.xlu0 %v1192_v48, %s2956_s0  ;;  %v1894_v48 = vld [vmem:[#allocation15 + $0x10] sm:$0xff] }
 0x5b3   : > { %v1272_v51 = vpop.xlane.xlu0 %1271 }
 0x5b4   : > { %v1273_v52 = vsub.f32 %v1266_v46, %v1272_v51  ;;  %v1892_v46 = vld [vmem:[#allocation15] sm:$0xff] }
 0x5b6   : > { %v1274_v53 = vmul.f32 1.442695, %v1273_v52 }
 0x5b7   : > { %v1364_v54 = vpop.permute.xlu0 %1363 }
 0x5b8   : > { %2678 = vpow2.f32 %v1274_v53 }
 0x5bb   : > { %v1542_v55 = vpop.permute.xlu0 %1541 }
 0x5bc   : > { %2502 = vmatpush3.xpose.msk.msra.mxu0 %vm1193_vm10, %v1542_v55 }
 0x5bd   : > { %2511 = vmatprep.subr.mxu0 %v2944_v9 }
 0x5bf   : > { %v1720_v62 = vpop.permute.xlu0 %1719 }
 0x5c5   : > { %v2679_v56 = vpop.eup %2678 }
 0x5c6   : > { %v1276_v57 = vsel %vm1193_vm10, %v2679_v56, 0.0 }
 0x5c7   : > { %1277 = vadd.xlane.f32.xlu1 %v1276_v57 }
 0x5d8   : > { %1538 = vrot.lane.b32.xlu1 %v1357_v8, %s2955_s22 }
 0x5dc   : > { %1716 = vrot.lane.b32.xlu1 %v1357_v8, %s2956_s0  ;;  %v1893_v8 = vld [vmem:[#allocation15 + $0x8] sm:$0xff] }
 0x650   : > { %v1278_v60 = vpop.xlane.xlu1 %1277 }
 0x651   : > { %2680 = vrcp.f32 %v1278_v60 }
 0x654   : > { %v1539_v61 = vpop.permute.xlu1 %1538 }
 0x655   : > { %2504 = vmatmul.mubr.msk.f32.vlgmr.msra.gmra.mxu0 %vm1193_vm10, %v1539_v61 }
 0x656   : > { %2512 = vmatpush3.xpose.msk.msra.mxu0 %vm1193_vm10, %v1720_v62  ;;  %2513 = vmatprep.mubr.msk.f32.mxu0 %vm2945_vm1, %v2944_v9 }
 0x657   : > { %2521 = vmatprep.subr.mxu0 %v2944_v9 }
 0x658   : > { %v1717_v63 = vpop.permute.xlu1 %1716 }
 0x659   : > { %2514 = vmatmul.mubr.msk.f32.vlgmr.msra.gmra.mxu0 %vm1193_vm10, %v1717_v63 }
 0x65a   : > { %2529 = vmatprep.mubr.msk.f32.mxu0 %vm2945_vm1, %v2944_v9  ;;  %2522 = vmatpush3.msra.mxu0 %v1895_v47 }
 0x65b   : > { %2523 = vmatprep.subr.mxu0 %v2944_v9 }
 0x65c   : > { %2524 = vmatpush3.msra.mxu0 %v1894_v48 }
 0x65d   : > { %2525 = vmatprep.subr.mxu0 %v2944_v9 }
 0x65e   : > { %v2681_v1 = vpop.eup %2680  ;;  %2526 = vmatpush3.msra.mxu0 %v1893_v8 }
 0x65f   : > { %v1281_v2 = vmul.f32 %v2681_v1, %v2679_v56  ;;  %2527 = vmatprep.subr.mxu0 %v2944_v9 }
 0x660   : > { %2528 = vmatpush3.msra.mxu0 %v1892_v46 }
 0x661   : > { %2489 = vmatmul.mubr.msk.f32.vlgmr.msra.gmra.mxu1 %vm1193_vm10, %v1281_v2  ;;  %2532 = vmatprep.subr.mxu0 %v2944_v9 }
 0x662   : > { %2492 = vmatpush3.xpose.msk.msra.mxu1 %vm1193_vm10, %v1364_v54  ;;  %2493 = vmatprep.mubr.msk.f32.mxu1 %vm2945_vm1, %v2944_v9 }
 0x663   : > { %2496 = vmatprep.subr.mxu1 %v2944_v9 }
 0x665   : > { %2494 = vmatmul.mubr.msk.f32.vlgmr.msra.gmra.mxu1 %vm1193_vm10, %v1361_v59  ;;  %v1971_v59 = vsub.s32 2, %v3283_v20 }
 0x666   : > { %2498 = vmatprep.mubr.msk.f32.mxu1 %vm2945_vm1, %v2944_v9 }
 0x667   : > { %v1972_v60 = vrot.slane %v3285_v21, %v1971_v59 }
 0x715   : > { %v1613_v3 = vpop.f32.mrf.mxu0 }
 0x716   : > { %v1617_v4 = vsel %vm1193_vm10, %v1613_v3, -inf }
 0x717   : > { %1618 = vmax.xlane.f32.xlu1 %v1617_v4  ;;  %v2505_v5 = vpop.f32.mrf.mxu0 }
 0x719   : > { %v1791_v6 = vpop.f32.mrf.mxu0 }
 0x71a   : > { %v1795_v15 = vsel %vm1193_vm10, %v1791_v6, -inf }
 0x71b   : > { %v2515_v7 = vpop.f32.mrf.mxu0 }
 0x721   : > { %v1352_v10 = vpop.f32.mrf.mxu1 }
 0x722   : > { %1356 = vst.msk [vmem:[#allocation5] sm:$0xff] %vm1193_vm10, %v1352_v10  ;;  %v2021_v10 = vld [vmem:[%s3649_s16 + $0x38] sm:$0xff] }
 0x723   : > { %v2490_v11 = vpop.f32.mrf.mxu1 }
 0x724   : > { %v2019_v11 = vld [vmem:[%s3649_s16 + $0x28] sm:$0xff] }
 0x725   : > { %v1435_v12 = vpop.f32.mrf.mxu1 }
 0x726   : > { %v1439_v13 = vsel %vm1193_vm10, %v1435_v12, -inf }
 0x727   : > { %1440 = vmax.xlane.f32.xlu0 %v1439_v13  ;;  %v2495_v14 = vpop.f32.mrf.mxu1  ;;  %v2017_v13 = vld [vmem:[%s3649_s16 + $0x18] sm:$0xff] }
 0x728   : > { %v2016_v14 = vld [vmem:[%s3649_s16 + $0x10] sm:$0xff] }
 0x72b   : > { %1796 = vmax.xlane.f32.xlu0 %v1795_v15  ;;  %v2015_v15 = vld [vmem:[%s3649_s16 + $0x8] sm:$0xff] }
 0x7a0   : > { %v1619_v16 = vpop.xlane.xlu1 %1618 }
 0x7a1   : > { %v1620_v17 = vsub.f32 %v1613_v3, %v1619_v16  ;;  %v2014_v16 = vld [vmem:[%s3649_s16] sm:$0xff] }
 0x7a3   : > { %v1621_v18 = vmul.f32 1.442695, %v1620_v17 }
 0x7a5   : > { %2682 = vpow2.f32 %v1621_v18 }
 0x7b0   : > { %v1441_v19 = vpop.xlane.xlu0 %1440 }
 0x7b1   : > { %v1442_v23 = vsub.f32 %v1435_v12, %v1441_v19  ;;  %v2018_v12 = vld [vmem:[%s3649_s16 + $0x20] sm:$0xff] }
 0x7b2   : > { %v2683_v24 = vpop.eup %2682 }
 0x7b3   : > { %v1443_v25 = vmul.f32 1.442695, %v1442_v23  ;;  %v1623_v58 = vsel %vm1193_vm10, %v2683_v24, 0.0  ;;  %v2006_v23 = vsub.s32 4, %v3283_v20 }
 0x7b4   : > { %1624 = vadd.xlane.f32.xlu0 %v1623_v58  ;;  %v1797_v27 = vpop.xlane.xlu0 %1796 }
 0x7b5   : > { %2684 = vpow2.f32 %v1443_v25  ;;  %v1798_v28 = vsub.f32 %v1791_v6, %v1797_v27  ;;  %v2390_v25 = vld [vmem:[%s3643_s10] ss:$0 sm:$0xff]  ;;  %v2011_v27 = vsub.s32 3, %v3283_v20 }
 0x7b7   : > { %v1799_v29 = vmul.f32 1.442695, %v1798_v28  ;;  %v2391_v28 = vld [vmem:[%s3644_s11] ss:$0 sm:$0xff] }
 0x7b9   : > { %2686 = vpow2.f32 %v1799_v29  ;;  %v2007_v29 = vrot.slane %v3288_v22, %v2006_v23  ;;  %v2121_v22 = vld [vmem:[%s3701_s15 + $0x48] sm:$0xff] }
 0x7c2   : > { %v2685_v30 = vpop.eup %2684 }
 0x7c3   : > { %v1445_v31 = vsel %vm1193_vm10, %v2685_v30, 0.0 }
 0x7c4   : > { %1446 = vadd.xlane.f32.xlu0 %v1445_v31 }
 0x7c6   : > { %v2687_v32 = vpop.eup %2686 }
 0x7c7   : > { %v1801_v33 = vsel %vm1193_vm10, %v2687_v32, 0.0 }
 0x7c8   : > { %1802 = vadd.xlane.f32.xlu1 %v1801_v33 }
 0x7d9   : > { %1631 = vrot.lane.b32.xlu1 %v3436_v26, %s2955_s22 }
 0x7da   : > { %1453 = vrot.lane.b32.xlu0 %v3436_v26, %s2954_s2  ;;  %s3702_s2 = sld [smem:[#allocation36_spill]] }
 0x7dd   : > { %1809 = vrot.lane.b32.xlu1 %v3436_v26, %s2956_s0  ;;  %s2206_s0 = scalar_lea.sflag [#allocation8], %s3212_s29 }
 0x7e0   : > { %s2217_s22 = scalar_lea.hbm %s3702_s2, %s2396_s30 }
 0x83d   : > { %v1625_v34 = vpop.xlane.xlu0 %1624 }
 0x84d   : > { %v1447_v35 = vpop.xlane.xlu0 %1446 }
 0x84e   : > { %2688 = vrcp.f32 %v1447_v35  ;;  %v2123_v35 = vld [vmem:[%s3701_s15 + $0x58] sm:$0xff] }
 0x84f   : > { %2690 = vrcp.f32 %v1625_v34 }
 0x851   : > { %v1803_v36 = vpop.xlane.xlu1 %1802  ;;  %v1454_v37 = vpop.permute.xlu0 %1453 }
 0x852   : > { %2497 = vmatpush3.msra.mxu1 %v1454_v37  ;;  %2692 = vrcp.f32 %v1803_v36  ;;  %v2122_v36 = vld [vmem:[%s3701_s15 + $0x50] sm:$0xff]  ;;  %v2120_v37 = vld [vmem:[%s3701_s15 + $0x40] sm:$0xff] }
 0x853   : > { %2506 = vmatprep.subr.mxu1 %v2944_v9 }
 0x855   : > { %v1632_v39 = vpop.permute.xlu1 %1631 }
 0x859   : > { %v1810_v44 = vpop.permute.xlu1 %1809 }
 0x85b   : > { %v2689_v38 = vpop.eup %2688 }
 0x85c   : > { %v1450_v40 = vmul.f32 %v2689_v38, %v2685_v30  ;;  %v2691_v41 = vpop.eup %2690  ;;  %v2119_v38 = vld [vmem:[%s3701_s15 + $0x38] sm:$0xff] }
 0x85d   : > { %v1628_v42 = vmul.f32 %v2691_v41, %v2683_v24  ;;  %v2116_v41 = vld [vmem:[%s3701_s15 + $0x20] sm:$0xff] }
 0x85e   : > { %2499 = vmatmul.mubr.msk.f32.vlgmr.msra.gmra.mxu1 %vm1193_vm10, %v1450_v40  ;;  %v2117_v40 = vld [vmem:[%s3701_s15 + $0x28] sm:$0xff] }
 0x85f   : > { %2507 = vmatpush3.msra.mxu1 %v1632_v39  ;;  %2508 = vmatprep.mubr.msk.f32.mxu1 %vm2945_vm1, %v2944_v9  ;;  %v2693_v43 = vpop.eup %2692  ;;  %v2118_v39 = vld [vmem:[%s3701_s15 + $0x30] sm:$0xff] }
 0x860   : > { %2516 = vmatprep.subr.mxu1 %v2944_v9  ;;  %v1806_v45 = vmul.f32 %v2693_v43, %v2687_v32  ;;  %v2012_v32 = vrot.slane %v3285_v21, %v2011_v27  ;;  %v2114_v43 = vld [vmem:[%s3701_s15 + $0x10] sm:$0xff] }
 0x862   : > { %2509 = vmatmul.mubr.msk.f32.vlgmr.msra.gmra.mxu1 %vm1193_vm10, %v1628_v42  ;;  %v2115_v42 = vld [vmem:[%s3701_s15 + $0x18] sm:$0xff] }
 0x863   : > { %2517 = vmatpush3.msra.mxu1 %v1810_v44  ;;  %2518 = vmatprep.mubr.msk.f32.mxu1 %vm2945_vm1, %v2944_v9  ;;  %v2113_v44 = vld [vmem:[%s3701_s15 + $0x8] sm:$0xff] }
 0x864   : > { %2049 = vmatprep.subr.mxu1 %v2021_v10 }
 0x866   : > { %2519 = vmatmul.mubr.msk.f32.vlgmr.msra.gmra.mxu1 %vm1193_vm10, %v1806_v45  ;;  %v2112_v45 = vld [vmem:[%s3701_s15] sm:$0xff] }
 0x867   : > { %2089 = vmatprep.mubr.f32.mxu1 %v2944_v9 }
 0x91e   : > { %v1525_v26 = vpop.f32.mrf.mxu1 }
 0x91f   : > { %1530 = vrot.lane.b32.xlu1 %v1525_v26, %s2948_s17  ;;  %s2858_s17 = scalar_lea.vmem %s2220_s7, 128 }
 0x920   : > { %v2500_v49 = vpop.f32.mrf.mxu1  ;;  %p2859_p2 = scmp.ne.s32.totalorder %s2220_s7, %s2858_s17 }
 0x922   : > { %v1703_v50 = vpop.f32.mrf.mxu1  ;;  %p2860_p9 = pnand %p2859_p2, %p3703_p8 }
 0x923   : > { %1708 = vrot.lane.b32.xlu0 %v1703_v50, %s2949_s25  ;;  %s2864_s25 = scalar_lea.vmem %s2863_s23, 256 }
 0x924   : > { %v2510_v51 = vpop.f32.mrf.mxu1  ;;  %p2861_p12 = pneg %p2860_p9  ;;  %p2866_p4 = scmp.lt.s32.totalorder %s2864_s25, %s2858_s17 }
 0x926   : > { %v1881_v52 = vpop.f32.mrf.mxu1  ;;  %p2867_p6 = por %p2866_p4, %p2865_p3 }
 0x927   : > { %1886 = vrot.lane.b32.xlu1 %v1881_v52, %s2951_s6 }
 0x928   : > { %v2520_v53 = vpop.f32.mrf.mxu1  ;;  %p2868_p5 = pnand %p2867_p6, %p2861_p12 }
 0x991   : > { %v1531_v54 = vpop.permute.xlu1 %1530 }
 0x992   : > { %1534 = vst.msk [vmem:[#allocation5] sm:$0xff] %vm1533_vm11, %v1531_v54  ;;  %v2200_v54 = vsub.s32 5, %v3283_v20 }
 0x995   : > { %v1709_v55 = vpop.permute.xlu0 %1708 }
 0x996   : > { %1712 = vst.msk [vmem:[#allocation5] sm:$0xff] %vm1711_vm12, %v1709_v55  ;;  %v2201_v55 = vrot.slane %v3285_v21, %v2200_v54 }
 0x999   : > { %v1887_v56 = vpop.permute.xlu1 %1886 }
 0x99a   : > { %1890 = vst.msk [vmem:[#allocation5] sm:$0xff] %vm1889_vm13, %v1887_v56 }
 0x9a1   : > { %v1891_v57 = vld [vmem:[#allocation5] sm:$0xff] }
 0x9a2   : > { %2530 = vmatmul.mubr.msk.f32.vlgmr.msra.gmra.mxu0 %vm677_vm0, %v1891_v57 }
 0x9a3   : > { %2556 = vmatprep.mubr.msk.f32.mxu0 %vm2945_vm1, %v2944_v9  ;;  %2533 = vmatpush3.msra.mxu0 %v2123_v35 }
 0x9a4   : > { %2534 = vmatprep.subr.mxu0 %v2944_v9 }
 0x9a5   : > { %2535 = vmatpush3.msra.mxu0 %v2122_v36 }
 0x9a6   : > { %2536 = vmatprep.subr.mxu0 %v2944_v9 }
 0x9a7   : > { %2537 = vmatpush3.msra.mxu0 %v2121_v22 }
 0x9a8   : > { %2538 = vmatprep.subr.mxu0 %v2944_v9 }
 0x9a9   : > { %2539 = vmatpush3.msra.mxu0 %v2120_v37 }
 0x9aa   : > { %2540 = vmatprep.subr.mxu0 %v2944_v9 }
 0x9ab   : > { %2541 = vmatpush3.msra.mxu0 %v2119_v38 }
 0x9ac   : > { %2542 = vmatprep.subr.mxu0 %v2944_v9 }
 0x9ad   : > { %2543 = vmatpush3.msra.mxu0 %v2118_v39 }
 0x9ae   : > { %2544 = vmatprep.subr.mxu0 %v2944_v9 }
 0x9af   : > { %2545 = vmatpush3.msra.mxu0 %v2117_v40 }
 0x9b0   : > { %2546 = vmatprep.subr.mxu0 %v2944_v9 }
 0x9b1   : > { %2547 = vmatpush3.msra.mxu0 %v2116_v41 }
 0x9b2   : > { %2548 = vmatprep.subr.mxu0 %v2944_v9 }
 0x9b3   : > { %2549 = vmatpush3.msra.mxu0 %v2115_v42 }
 0x9b4   : > { %2550 = vmatprep.subr.mxu0 %v2944_v9 }
 0x9b5   : > { %2551 = vmatpush3.msra.mxu0 %v2114_v43 }
 0x9b6   : > { %2552 = vmatprep.subr.mxu0 %v2944_v9 }
 0x9b7   : > { %2553 = vmatpush3.msra.mxu0 %v2113_v44 }
 0x9b8   : > { %2554 = vmatprep.subr.mxu0 %v2944_v9 }
 0x9b9   : > { %2555 = vmatpush3.msra.mxu0 %v2112_v45 }
 0xa62   : > { %v1965_v61 = vpop.f32.mrf.mxu0 }
 0xa63   : > { %v1973_v62 = vmul.f32 %v1972_v60, %v1965_v61 }
 0xa64   : > { %v2531_v63 = vpop.f32.mrf.mxu0 }
 0xa65   : > { %v3503_v1 = vadd.f32 %v1973_v62, %v3234_v0  ;;  %v2020_v0 = vld [vmem:[%s3649_s16 + $0x30] sm:$0xff] }
 0xa66   : > { %2050 = vmatpush1.msra.mxu1 %v2020_v0 }
 0xa67   : > { %v1977_v2 = vsel %vm677_vm0, %v3503_v1, 0.0  ;;  %2051 = vmatprep.subr.mxu1 %v2019_v11 }
 0xa68   : > { %1978 = vadd.xlane.f32.xlu0 %v1977_v2  ;;  %2052 = vmatpush1.msra.mxu1 %v2018_v12 }
 0xa69   : > { %2053 = vmatprep.subr.mxu1 %v2017_v13 }
 0xa6a   : > { %2054 = vmatpush1.msra.mxu1 %v2016_v14 }
 0xa6b   : > { %2055 = vmatprep.subr.mxu1 %v2015_v15 }
 0xa6c   : > { %2056 = vmatpush1.msra.mxu1 %v2014_v16 }
 0xaf1   : > { %v1979_v3 = vpop.xlane.xlu0 %1978 }
 0xaf2   : > { %v1980_v4 = vmul.f32 0.03125, %v1979_v3 }
 0xaf4   : > { %v1981_v5 = vsub.f32 %v3503_v1, %v1980_v4 }
 0xaf6   : > { %v1982_v6 = vmul.f32 %v1981_v5, %v1981_v5 }
 0xaf8   : > { %v1983_v7 = vsel %vm677_vm0, %v1982_v6, 0.0 }
 0xaf9   : > { %1984 = vadd.xlane.f32.xlu1 %v1983_v7 }
 0xb82   : > { %v1985_v17 = vpop.xlane.xlu1 %1984 }
 0xb83   : > { %v1986_v18 = vmul.f32 0.03125, %v1985_v17 }
 0xb85   : > { %v1987_v19 = vadd.f32 1e-05, %v1986_v18 }
 0xb87   : > { %2694 = vrsqrt.f32 %v1987_v19 }
 0xb94   : > { %v2695_v24 = vpop.eup %2694 }
 0xb95   : > { %v1989_v58 = vmul.f32 %v2695_v24, %v1981_v5 }
 0xb97   : > { %v1996_v30 = vmul.f32 %v2390_v25, %v1989_v58 }
 0xb99   : > { %v2003_v31 = vadd.f32 %v2391_v28, %v1996_v30 }
 0xb9b   : > { %v2008_v33 = vmul.f32 %v2007_v29, %v2003_v31 }
 0xb9d   : > { %v2013_v34 = vadd.f32 %v2012_v32, %v2008_v33 }
 0xb9f   : > { %2392 = vmatmul.mubr.msk.f32.vlgmr.msra.gmra.mxu1 %vm677_vm0, %v2013_v34 }
 0xc5f   : > { %v2091_v47 = vpop.f32.mrf.mxu1 }
 0xc60   : > { %2105 = vrot.lane.b32.xlu0 %v2091_v47, %s2957_s19  ;;  %v2393_v8 = vmul.f32 -1.442695, %v2091_v47 }
 0xc61   : > { %v2093_v48 = vpop.f32.mrf.mxu1 }
 0xc62   : > { %2107 = vrot.lane.b32.xlu1 %v2093_v48, %s2957_s19  ;;  %2696 = vpow2.f32 %v2393_v8 }
 0xc6f   : > { %v2697_v26 = vpop.eup %2696 }
 0xc70   : > { %v2099_v46 = vadd.f32 1.0, %v2697_v26 }
 0xc72   : > { %2698 = vrcp.f32 %v2099_v46 }
 0xc7f   : > { %v2699_v49 = vpop.eup %2698 }
 0xc80   : > { %v2102_v50 = vmul.f32 %v2699_v49, %v2091_v47 }
 0xcd2   : > { %v2106_v51 = vpop.permute.xlu0 %2105 }
 0xcd4   : > { %v2108_v52 = vpop.permute.xlu1 %2107 }
 0xcd5   : > { %v2109_v53 = vsel %vm677_vm0, %v2106_v51, %v2108_v52 }
 0xcd6   : > { %v2111_v9 = vmul.f32 %v2109_v53, %v2102_v50 }
 0xcd8   : > { %2557 = vmatmul.mubr.msk.f32.vlgmr.msra.gmra.mxu0 %vm2124_vm14, %v2111_v9 }
 0xd98   : > { %v2194_v56 = vpop.f32.mrf.mxu0 }
 0xd99   : > { %v2202_v57 = vmul.f32 %v2201_v55, %v2194_v56 }
 0xd9a   : > { %v2558_v59 = vpop.f32.mrf.mxu0 }
 0xd9b   : > { %v2203_v60 = vadd.f32 %v2202_v57, %v3503_v1 }
 0xd9d   : > { %2204 = vst.msk [vmem:[%s668_s5] sm:$0xff] %vm677_vm0, %v2203_v60 }
 0xd9e   : > { %2871 = shalt.err (!%p2868_p5)
}
 0xd9f   : > { %s2872_s6 = scalar_lea.hbm %s2217_s22, 128  ;;  %s2876_s19 = scalar_lea.hbm %s3702_s2, 256 }
 0xda0   : > { %p2873_p10 = scmp.ne.s32.totalorder %s2217_s22, %s2872_s6  ;;  %p2877_p7 = scmp.lt.s32.totalorder %s2217_s22, %s3702_s2 }
 0xda1   : > { %p2878_p13 = scmp.lt.s32.totalorder %s2876_s19, %s2872_s6 }
 0xda2   : > { %p2874_p11 = pnand %p2873_p10, %p3703_p8 }
 0xda3   : > { %p2879_p0 = por %p2878_p13, %p2877_p7 }
 0xda4   : > { %p2875_p1 = pneg %p2874_p11 }
 0xda6   : > { %p2880_p2 = pnand %p2879_p0, %p2875_p1 }
 0xda8   : > { %2883 = shalt.err (!%p2880_p2)
}
 0xda9   : > { %2581 = dma.vmem_to_hbm [thread:$0]  (%p3703_p8), %s2220_s7, 128, %s2217_s22, %s2206_s0  }
 0xdaa PF: > { %s3704_s20 = sld [smem:[#allocation24_spill]]  ;;  %s2231_s24 = sand.u32 1, %s2922_s27  }
 0xdab   : > { %p3705_p9 = scmp.ne.s32.totalorder %s3688_s26, 0  ;;  %s2232_s17 = scalar_lea.sflag [#allocation8], %s2231_s24 }
 0xdb0   : > { %p3706_p12 = scmp.ge.s32.totalorder %s3704_s20, 2 }
 0xdb2   : > { %p2604_p3 = pnand %p3706_p12, %p3705_p9 }
 0xdb4   : > { %p2605_p4 = pneg %p2604_p3 }
 0xdb6   : > { %2917 = dma.done.wait (%p2605_p4), %s2232_s17, 128  }
 0xdb7   : > { %2919 = vsyncadd (%p2605_p4), %s2232_s17, 4294967168  ;;  %s3707_s30 = sld [smem:[#allocation25_spill]]  ;;  %s3710_s27 = smov %s2926_s28 }
 0xdb8   : > { %s3708_s1 = sld [smem:[#allocation23_spill]] }
 0xdb9   : > { %s3709_s29 = sld [smem:[#allocation26_spill]] }
 0xdbd   : > { %p34_p6 = scmp.ge.s32.totalorder %s3707_s30, 4  }
 0xdbe   : > { %s3711_s28 = smov %s3708_s1 }
 0xdbf   :  { %36 = sbr.rel (!%p34_p6) target bundleno = 19 (0x13), region = 160 }
 0xdc4   :  { %2237 = vsyncpa [#allocation7], 1 }
 0xdc5   :  { %2239 = vsyncpa [#allocation7 + $0x1], 1 }
 0xdc6   :  { %2240 = vsyncpa [#allocation10], 1 }
 0xdc7   :  { %2241 = vsyncpa [#allocation13], 1 }
 0xdc8   :  { %2242 = vsyncpa [#allocation16], 1 }
 0xdc9   :  { %2243 = vsyncpa [#allocation8], 1 }
 0xdca   :  { %2245 = vsyncpa [#allocation8 + $0x1], 1 }

</bundles_post_ra>
